<compile_context>
chip_gen: v7x
topology: tpu7x:2x2x1
jax: 0.10.0
libtpu: 0.0.40
codegen_flags: <defaults>
</compile_context>

<pallas_src>
import math

import jax
import jax.numpy as jnp
from jax.experimental import pallas as pl
from jax.experimental.pallas import tpu as pltpu


def _round_up(x, m):
    return (x + m - 1) // m * m


def _pick_row_tile(h, target=8):
    # Largest divisor of H that is <= target, so row tiles cover H exactly.
    # Awkward (e.g. prime) H falls back to one whole-image row tile.
    # TODO(synk): use pl.Element-indexed overlapping H blocks to row-tile prime H too.
    for t in range(min(h, target), 0, -1):
        if h % t == 0:
            return t if t >= 4 else h
    return h


def _box3_matrix(w):
    # Banded (W, W+2) 0/1 matrix: out[j] = sum_{k=j..j+2} in[k]  (horizontal 3-tap).
    rows = jnp.arange(w)[:, None]
    cols = jnp.arange(w + 2)[None, :]
    return ((cols >= rows) & (cols <= rows + 2)).astype(jnp.bfloat16)


# ---------------------------------------------------------------------------
# Fused Pallas kernel: 1x1 conv (commuted) + separable 3x3 box sum + BN + ReLU
# ---------------------------------------------------------------------------

def _avgpool_conv_bn_relu_kernel(xp_ref, w_ref, s3_ref, scale_ref, bias_ref,
                                 o_ref, z_ref):
    # xp_ref   : (1, H+2, W+2, C)   bf16 zero-padded NHWC image (one batch, resident)
    # w_ref    : (C, Npad)          bf16 1x1-conv weights, Npad = round_up(C_out, 128)
    # s3_ref   : (W, W+2)           bf16 banded 3-tap matrix (horizontal pool pass)
    # scale_ref: (1, Npad)          f32 folded BN scale * 1/9
    # bias_ref : (1, Npad)          f32 folded BN bias
    # o_ref    : (1, TH, W, Npad)   bf16 output row tile
    # z_ref    : (TH+2, W+2, Npad)  f32 scratch: 1x1-conv output for this tile's rows
    th = o_ref.shape[1]
    r0 = pl.program_id(1) * th          # first padded-image row of this row tile

    # --- 1x1 conv, commuted ahead of the (linear) pool: bf16 x bf16 -> f32 on MXU.
    # Row-by-row keeps the matmul LHS 2D, so no flatten / relayout ever happens.
    wmat = w_ref[...]
    for r in range(th + 2):
        z_ref[r] = jnp.dot(xp_ref[0, r0 + r], wmat,
                           preferred_element_type=jnp.float32)

    # --- separable 3x3 box sum + folded BN (incl. 1/9) + ReLU, per output row.
    s3 = s3_ref[...]
    scl = scale_ref[...]
    bia = bias_ref[...]
    for h in range(th):
        # Vertical 3-tap: slices along the untiled row axis (free, f32).
        vsum = z_ref[h] + z_ref[h + 1] + z_ref[h + 2]                 # (W+2, Npad)
        # Horizontal 3-tap as a tiny banded matmul -> no sublane-misaligned shifts.
        hsum = jnp.dot(s3, vsum.astype(jnp.bfloat16),
                       preferred_element_type=jnp.float32)            # (W, Npad)
        y = hsum * scl + bia
        o_ref[0, h] = jnp.maximum(y, 0.0).astype(o_ref.dtype)


def avg_pool_branch(x_nchw, params):
    """AvgPoolBranch forward: NCHW in -> NCHW out (PyTorch semantics)."""
    w, scale, bias, c_out = params["w"], params["scale"], params["bias"], params["c_out"]
    B, C, H, W = x_nchw.shape
    n_pad = w.shape[1]
    th = _pick_row_tile(H)
    assert H % th == 0
    s3 = _box3_matrix(W)

    # NCHW -> NHWC, cast to bf16, and 1-pixel spatial zero pad; XLA fuses these
    # into a single copy feeding the kernel.  (If the surrounding net can stay
    # NHWC, this transpose and the one after the kernel should be dropped.)
    x = jnp.transpose(x_nchw, (0, 2, 3, 1)).astype(jnp.bfloat16)
    xp = jnp.pad(x, ((0, 0), (1, 1), (1, 1), (0, 0)))

    out = pl.pallas_call(
        _avgpool_conv_bn_relu_kernel,
        out_shape=jax.ShapeDtypeStruct((B, H, W, n_pad), jnp.bfloat16),
        grid=(B, H // th),
        in_specs=[
            # Full padded image; block index ignores the row-tile axis, so Pallas
            # DMAs it once per batch and keeps it VMEM-resident (halo rows are
            # just in-VMEM slices, no re-fetch).
            pl.BlockSpec((1, H + 2, W + 2, C), lambda b, i: (b, 0, 0, 0)),
            pl.BlockSpec((C, n_pad), lambda b, i: (0, 0)),
            pl.BlockSpec((W, W + 2), lambda b, i: (0, 0)),
            pl.BlockSpec((1, n_pad), lambda b, i: (0, 0)),
            pl.BlockSpec((1, n_pad), lambda b, i: (0, 0)),
        ],
        out_specs=pl.BlockSpec((1, th, W, n_pad), lambda b, i: (b, i, 0, 0)),
        scratch_shapes=[pltpu.VMEM((th + 2, W + 2, n_pad), jnp.float32)],
        compiler_params=pltpu.CompilerParams(
            dimension_semantics=("parallel", "parallel"),
        ),
    )(xp, w, s3, scale, bias)

    # Drop the channel-pad lanes (fuses into the NHWC->NCHW transpose copy) and
    # return NCHW f32, matching the PyTorch module's output dtype.
    out = out[..., :c_out]
    return jnp.transpose(out, (0, 3, 1, 2)).astype(jnp.float32)


# ---------------------------------------------------------------------------
# Parameter construction (deterministic, in-script)
# ---------------------------------------------------------------------------

def make_avg_pool_branch_params(key, in_channels, out_channels):
    # Conv2d(1x1, bias=False) default init: kaiming_uniform_(a=sqrt(5)) -> U(+-1/sqrt(fan_in)).
    bound = 1.0 / math.sqrt(in_channels)
    w = jax.random.uniform(key, (in_channels, out_channels), jnp.float32, -bound, bound)

    # BatchNorm2d(eps=1e-3), eval mode with fresh statistics, folded to scale/bias.
    eps = 1e-3
    gamma = jnp.ones((out_channels,), jnp.float32)
    beta = jnp.zeros((out_channels,), jnp.float32)
    running_mean = jnp.zeros((out_channels,), jnp.float32)
    running_var = jnp.ones((out_channels,), jnp.float32)
    scale = gamma / jnp.sqrt(running_var + eps)
    bias = beta - running_mean * scale
    # The kernel computes the un-normalized 3x3 box SUM, so fold the 1/9 average
    # divisor (count_include_pad=True) into the BN scale.
    scale_k = scale / 9.0

    # Pad output channels to a multiple of 128 for lane-dense MXU/VPU work and
    # unmasked stores.  Pad lanes have scale = bias = 0 -> relu(0) = 0, and are
    # sliced off in the wrapper.  (Kept at 128, not 256: this kernel is DMA-bound,
    # not MXU-bound, so wider padding would only add wasted bytes.)
    n_pad = _round_up(out_channels, 128)
    w_p = jnp.zeros((in_channels, n_pad), jnp.bfloat16).at[:, :out_channels].set(
        w.astype(jnp.bfloat16))
    s_p = jnp.zeros((1, n_pad), jnp.float32).at[:, :out_channels].set(scale_k)
    b_p = jnp.zeros((1, n_pad), jnp.float32).at[:, :out_channels].set(bias)
    return {"w": w_p, "scale": s_p, "bias": b_p, "c_out": out_channels}


# ---------------------------------------------------------------------------
# Pure-JAX f32 reference (for a correctness sanity check)
# ---------------------------------------------------------------------------

def _reference_avg_pool_branch(x_nchw, params):
    c_out = params["c_out"]
    w = params["w"].astype(jnp.float32)[:, :c_out]
    scale = params["scale"][0, :c_out] * 9.0      # undo the folded 1/9 -> plain BN scale
    bias = params["bias"][0, :c_out]
    x = jnp.transpose(x_nchw, (0, 2, 3, 1))
    B, H, W, C = x.shape
    xp = jnp.pad(x, ((0, 0), (1, 1), (1, 1), (0, 0)))
    acc = jnp.zeros_like(x)
    for dh in range(3):
        for dw in range(3):
            acc = acc + xp[:, dh:dh + H, dw:dw + W, :]
    pooled = acc / 9.0
    y = jnp.einsum("bhwc,cn->bhwn", pooled, w)
    y = jnp.maximum(y * scale + bias, 0.0)
    return jnp.transpose(y, (0, 3, 1, 2))


if __name__ == "__main__":
    key = jax.random.PRNGKey(0)
    k_w, k_x = jax.random.split(key)

    # Small InceptionV3-like AvgPoolBranch: 192 -> 64 channels, batch=2, 16x16 spatial.
    in_channels, out_channels = 192, 64
    params = make_avg_pool_branch_params(k_w, in_channels, out_channels)
    x = jax.random.normal(k_x, (2, in_channels, 16, 16), dtype=jnp.float32)

    fwd = jax.jit(lambda inp: avg_pool_branch(inp, params))
    out = jax.block_until_ready(fwd(x))

    assert out.shape == (2, out_channels, 16, 16), out.shape
    assert out.dtype == jnp.float32
    assert bool(jnp.all(jnp.isfinite(out)))

    # Numerical check vs. pure-JAX f32 reference (kernel uses bf16 activations,
    # weights and output storage; ~1e-2-level relative error is expected).
    ref = jax.block_until_ready(_reference_avg_pool_branch(x, params))
    assert bool(jnp.allclose(out, ref, rtol=5e-2, atol=5e-2)), float(
        jnp.max(jnp.abs(out - ref)))

    print("KERNEL_OK")
</pallas_src>

<mosaic_0001>
module attributes {stable_mosaic.version = 11 : i64} {
  func.func @_avgpool_conv_bn_relu_kernel(%arg0: i32, %arg1: i32, %arg2: memref<1x18x18x192xbf16, #tpu.memory_space<vmem>>, %arg3: memref<192x128xbf16, #tpu.memory_space<vmem>>, %arg4: memref<16x18xbf16, #tpu.memory_space<vmem>>, %arg5: memref<1x128xf32, #tpu.memory_space<vmem>>, %arg6: memref<1x128xf32, #tpu.memory_space<vmem>>, %arg7: memref<1x8x16x128xbf16, #tpu.memory_space<vmem>>, %arg8: memref<10x18x128xf32, #tpu.memory_space<vmem>>) attributes {dimension_semantics = [#tpu.dimension_semantics<parallel>, #tpu.dimension_semantics<parallel>], iteration_bounds = array<i64: 2, 2>, scalar_prefetch = 0 : i64, scratch_operands = 1 : i64, tpu.core_type = #tpu.core_type<tc>, window_params = [{transform_indices = @transform_0, window_bounds = array<i64: 1, 18, 18, 192>}, {pipeline_mode = #tpu.pipeline_mode<synchronous>, transform_indices = @transform_1, window_bounds = array<i64: 192, 128>}, {pipeline_mode = #tpu.pipeline_mode<synchronous>, transform_indices = @transform_2, window_bounds = array<i64: 16, 18>}, {pipeline_mode = #tpu.pipeline_mode<synchronous>, transform_indices = @transform_3, window_bounds = array<i64: 1, 128>}, {pipeline_mode = #tpu.pipeline_mode<synchronous>, transform_indices = @transform_4, window_bounds = array<i64: 1, 128>}, {transform_indices = @transform_5, window_bounds = array<i64: 1, 8, 16, 128>}]} {
    %c8_i32 = arith.constant 8 : i32
    %0 = arith.muli %arg1, %c8_i32 : i32
    %c0 = arith.constant 0 : index
    %c0_0 = arith.constant 0 : index
    %1 = vector.load %arg3[%c0, %c0_0] : memref<192x128xbf16, #tpu.memory_space<vmem>>, vector<192x128xbf16>
    %c0_i32 = arith.constant 0 : i32
    %2 = arith.addi %0, %c0_i32 : i32
    %c0_1 = arith.constant 0 : index
    %3 = arith.index_cast %2 : i32 to index
    %c0_2 = arith.constant 0 : index
    %c0_3 = arith.constant 0 : index
    %4 = vector.load %arg2[%c0_1, %3, %c0_2, %c0_3] : memref<1x18x18x192xbf16, #tpu.memory_space<vmem>>, vector<1x1x18x192xbf16>
    %5 = vector.shape_cast %4 : vector<1x1x18x192xbf16> to vector<18x192xbf16>
    %cst = arith.constant dense<0.000000e+00> : vector<18x128xf32>
    %6 = tpu.matmul %5, %1, %cst {dimension_numbers = #tpu.dot_dimension_numbers<[1], [0], [0], [1], [0, 0, 1, 1], [], []>} : vector<18x192xbf16>, vector<192x128xbf16>, vector<18x128xf32> -> vector<18x128xf32>
    %c0_4 = arith.constant 0 : index
    %c0_5 = arith.constant 0 : index
    %c0_6 = arith.constant 0 : index
    %7 = vector.load %arg8[%c0_4, %c0_5, %c0_6] : memref<10x18x128xf32, #tpu.memory_space<vmem>>, vector<1x18x128xf32>
    %8 = vector.shape_cast %7 : vector<1x18x128xf32> to vector<18x128xf32>
    %9 = vector.shape_cast %6 : vector<18x128xf32> to vector<1x18x128xf32>
    tpu.vector_store %arg8[%c0_4, %c0_5, %c0_6], %9 {strides = array<i32>} : memref<10x18x128xf32, #tpu.memory_space<vmem>>, vector<1x18x128xf32>,
    %c1_i32 = arith.constant 1 : i32
    %10 = arith.addi %0, %c1_i32 : i32
    %c0_7 = arith.constant 0 : index
    %11 = arith.index_cast %10 : i32 to index
    %c0_8 = arith.constant 0 : index
    %c0_9 = arith.constant 0 : index
    %12 = vector.load %arg2[%c0_7, %11, %c0_8, %c0_9] : memref<1x18x18x192xbf16, #tpu.memory_space<vmem>>, vector<1x1x18x192xbf16>
    %13 = vector.shape_cast %12 : vector<1x1x18x192xbf16> to vector<18x192xbf16>
    %cst_10 = arith.constant dense<0.000000e+00> : vector<18x128xf32>
    %14 = tpu.matmul %13, %1, %cst_10 {dimension_numbers = #tpu.dot_dimension_numbers<[1], [0], [0], [1], [0, 0, 1, 1], [], []>} : vector<18x192xbf16>, vector<192x128xbf16>, vector<18x128xf32> -> vector<18x128xf32>
    %c1 = arith.constant 1 : index
    %c0_11 = arith.constant 0 : index
    %c0_12 = arith.constant 0 : index
    %15 = vector.load %arg8[%c1, %c0_11, %c0_12] : memref<10x18x128xf32, #tpu.memory_space<vmem>>, vector<1x18x128xf32>
    %16 = vector.shape_cast %15 : vector<1x18x128xf32> to vector<18x128xf32>
    %17 = vector.shape_cast %14 : vector<18x128xf32> to vector<1x18x128xf32>
    tpu.vector_store %arg8[%c1, %c0_11, %c0_12], %17 {strides = array<i32>} : memref<10x18x128xf32, #tpu.memory_space<vmem>>, vector<1x18x128xf32>,
    %c2_i32 = arith.constant 2 : i32
    %18 = arith.addi %0, %c2_i32 : i32
    %c0_13 = arith.constant 0 : index
    %19 = arith.index_cast %18 : i32 to index
    %c0_14 = arith.constant 0 : index
    %c0_15 = arith.constant 0 : index
    %20 = vector.load %arg2[%c0_13, %19, %c0_14, %c0_15] : memref<1x18x18x192xbf16, #tpu.memory_space<vmem>>, vector<1x1x18x192xbf16>
    %21 = vector.shape_cast %20 : vector<1x1x18x192xbf16> to vector<18x192xbf16>
    %cst_16 = arith.constant dense<0.000000e+00> : vector<18x128xf32>
    %22 = tpu.matmul %21, %1, %cst_16 {dimension_numbers = #tpu.dot_dimension_numbers<[1], [0], [0], [1], [0, 0, 1, 1], [], []>} : vector<18x192xbf16>, vector<192x128xbf16>, vector<18x128xf32> -> vector<18x128xf32>
    %c2 = arith.constant 2 : index
    %c0_17 = arith.constant 0 : index
    %c0_18 = arith.constant 0 : index
    %23 = vector.load %arg8[%c2, %c0_17, %c0_18] : memref<10x18x128xf32, #tpu.memory_space<vmem>>, vector<1x18x128xf32>
    %24 = vector.shape_cast %23 : vector<1x18x128xf32> to vector<18x128xf32>
    %25 = vector.shape_cast %22 : vector<18x128xf32> to vector<1x18x128xf32>
    tpu.vector_store %arg8[%c2, %c0_17, %c0_18], %25 {strides = array<i32>} : memref<10x18x128xf32, #tpu.memory_space<vmem>>, vector<1x18x128xf32>,
    %c3_i32 = arith.constant 3 : i32
    %26 = arith.addi %0, %c3_i32 : i32
    %c0_19 = arith.constant 0 : index
    %27 = arith.index_cast %26 : i32 to index
    %c0_20 = arith.constant 0 : index
    %c0_21 = arith.constant 0 : index
    %28 = vector.load %arg2[%c0_19, %27, %c0_20, %c0_21] : memref<1x18x18x192xbf16, #tpu.memory_space<vmem>>, vector<1x1x18x192xbf16>
    %29 = vector.shape_cast %28 : vector<1x1x18x192xbf16> to vector<18x192xbf16>
    %cst_22 = arith.constant dense<0.000000e+00> : vector<18x128xf32>
    %30 = tpu.matmul %29, %1, %cst_22 {dimension_numbers = #tpu.dot_dimension_numbers<[1], [0], [0], [1], [0, 0, 1, 1], [], []>} : vector<18x192xbf16>, vector<192x128xbf16>, vector<18x128xf32> -> vector<18x128xf32>
    %c3 = arith.constant 3 : index
    %c0_23 = arith.constant 0 : index
    %c0_24 = arith.constant 0 : index
    %31 = vector.load %arg8[%c3, %c0_23, %c0_24] : memref<10x18x128xf32, #tpu.memory_space<vmem>>, vector<1x18x128xf32>
    %32 = vector.shape_cast %31 : vector<1x18x128xf32> to vector<18x128xf32>
    %33 = vector.shape_cast %30 : vector<18x128xf32> to vector<1x18x128xf32>
    tpu.vector_store %arg8[%c3, %c0_23, %c0_24], %33 {strides = array<i32>} : memref<10x18x128xf32, #tpu.memory_space<vmem>>, vector<1x18x128xf32>,
    %c4_i32 = arith.constant 4 : i32
    %34 = arith.addi %0, %c4_i32 : i32
    %c0_25 = arith.constant 0 : index
    %35 = arith.index_cast %34 : i32 to index
    %c0_26 = arith.constant 0 : index
    %c0_27 = arith.constant 0 : index
    %36 = vector.load %arg2[%c0_25, %35, %c0_26, %c0_27] : memref<1x18x18x192xbf16, #tpu.memory_space<vmem>>, vector<1x1x18x192xbf16>
    %37 = vector.shape_cast %36 : vector<1x1x18x192xbf16> to vector<18x192xbf16>
    %cst_28 = arith.constant dense<0.000000e+00> : vector<18x128xf32>
    %38 = tpu.matmul %37, %1, %cst_28 {dimension_numbers = #tpu.dot_dimension_numbers<[1], [0], [0], [1], [0, 0, 1, 1], [], []>} : vector<18x192xbf16>, vector<192x128xbf16>, vector<18x128xf32> -> vector<18x128xf32>
    %c4 = arith.constant 4 : index
    %c0_29 = arith.constant 0 : index
    %c0_30 = arith.constant 0 : index
    %39 = vector.load %arg8[%c4, %c0_29, %c0_30] : memref<10x18x128xf32, #tpu.memory_space<vmem>>, vector<1x18x128xf32>
    %40 = vector.shape_cast %39 : vector<1x18x128xf32> to vector<18x128xf32>
    %41 = vector.shape_cast %38 : vector<18x128xf32> to vector<1x18x128xf32>
    tpu.vector_store %arg8[%c4, %c0_29, %c0_30], %41 {strides = array<i32>} : memref<10x18x128xf32, #tpu.memory_space<vmem>>, vector<1x18x128xf32>,
    %c5_i32 = arith.constant 5 : i32
    %42 = arith.addi %0, %c5_i32 : i32
    %c0_31 = arith.constant 0 : index
    %43 = arith.index_cast %42 : i32 to index
    %c0_32 = arith.constant 0 : index
    %c0_33 = arith.constant 0 : index
    %44 = vector.load %arg2[%c0_31, %43, %c0_32, %c0_33] : memref<1x18x18x192xbf16, #tpu.memory_space<vmem>>, vector<1x1x18x192xbf16>
    %45 = vector.shape_cast %44 : vector<1x1x18x192xbf16> to vector<18x192xbf16>
    %cst_34 = arith.constant dense<0.000000e+00> : vector<18x128xf32>
    %46 = tpu.matmul %45, %1, %cst_34 {dimension_numbers = #tpu.dot_dimension_numbers<[1], [0], [0], [1], [0, 0, 1, 1], [], []>} : vector<18x192xbf16>, vector<192x128xbf16>, vector<18x128xf32> -> vector<18x128xf32>
    %c5 = arith.constant 5 : index
    %c0_35 = arith.constant 0 : index
    %c0_36 = arith.constant 0 : index
    %47 = vector.load %arg8[%c5, %c0_35, %c0_36] : memref<10x18x128xf32, #tpu.memory_space<vmem>>, vector<1x18x128xf32>
    %48 = vector.shape_cast %47 : vector<1x18x128xf32> to vector<18x128xf32>
    %49 = vector.shape_cast %46 : vector<18x128xf32> to vector<1x18x128xf32>
    tpu.vector_store %arg8[%c5, %c0_35, %c0_36], %49 {strides = array<i32>} : memref<10x18x128xf32, #tpu.memory_space<vmem>>, vector<1x18x128xf32>,
    %c6_i32 = arith.constant 6 : i32
    %50 = arith.addi %0, %c6_i32 : i32
    %c0_37 = arith.constant 0 : index
    %51 = arith.index_cast %50 : i32 to index
    %c0_38 = arith.constant 0 : index
    %c0_39 = arith.constant 0 : index
    %52 = vector.load %arg2[%c0_37, %51, %c0_38, %c0_39] : memref<1x18x18x192xbf16, #tpu.memory_space<vmem>>, vector<1x1x18x192xbf16>
    %53 = vector.shape_cast %52 : vector<1x1x18x192xbf16> to vector<18x192xbf16>
    %cst_40 = arith.constant dense<0.000000e+00> : vector<18x128xf32>
    %54 = tpu.matmul %53, %1, %cst_40 {dimension_numbers = #tpu.dot_dimension_numbers<[1], [0], [0], [1], [0, 0, 1, 1], [], []>} : vector<18x192xbf16>, vector<192x128xbf16>, vector<18x128xf32> -> vector<18x128xf32>
    %c6 = arith.constant 6 : index
    %c0_41 = arith.constant 0 : index
    %c0_42 = arith.constant 0 : index
    %55 = vector.load %arg8[%c6, %c0_41, %c0_42] : memref<10x18x128xf32, #tpu.memory_space<vmem>>, vector<1x18x128xf32>
    %56 = vector.shape_cast %55 : vector<1x18x128xf32> to vector<18x128xf32>
    %57 = vector.shape_cast %54 : vector<18x128xf32> to vector<1x18x128xf32>
    tpu.vector_store %arg8[%c6, %c0_41, %c0_42], %57 {strides = array<i32>} : memref<10x18x128xf32, #tpu.memory_space<vmem>>, vector<1x18x128xf32>,
    %c7_i32 = arith.constant 7 : i32
    %58 = arith.addi %0, %c7_i32 : i32
    %c0_43 = arith.constant 0 : index
    %59 = arith.index_cast %58 : i32 to index
    %c0_44 = arith.constant 0 : index
    %c0_45 = arith.constant 0 : index
    %60 = vector.load %arg2[%c0_43, %59, %c0_44, %c0_45] : memref<1x18x18x192xbf16, #tpu.memory_space<vmem>>, vector<1x1x18x192xbf16>
    %61 = vector.shape_cast %60 : vector<1x1x18x192xbf16> to vector<18x192xbf16>
    %cst_46 = arith.constant dense<0.000000e+00> : vector<18x128xf32>
    %62 = tpu.matmul %61, %1, %cst_46 {dimension_numbers = #tpu.dot_dimension_numbers<[1], [0], [0], [1], [0, 0, 1, 1], [], []>} : vector<18x192xbf16>, vector<192x128xbf16>, vector<18x128xf32> -> vector<18x128xf32>
    %c7 = arith.constant 7 : index
    %c0_47 = arith.constant 0 : index
    %c0_48 = arith.constant 0 : index
    %63 = vector.load %arg8[%c7, %c0_47, %c0_48] : memref<10x18x128xf32, #tpu.memory_space<vmem>>, vector<1x18x128xf32>
    %64 = vector.shape_cast %63 : vector<1x18x128xf32> to vector<18x128xf32>
    %65 = vector.shape_cast %62 : vector<18x128xf32> to vector<1x18x128xf32>
    tpu.vector_store %arg8[%c7, %c0_47, %c0_48], %65 {strides = array<i32>} : memref<10x18x128xf32, #tpu.memory_space<vmem>>, vector<1x18x128xf32>,
    %c8_i32_49 = arith.constant 8 : i32
    %66 = arith.addi %0, %c8_i32_49 : i32
    %c0_50 = arith.constant 0 : index
    %67 = arith.index_cast %66 : i32 to index
    %c0_51 = arith.constant 0 : index
    %c0_52 = arith.constant 0 : index
    %68 = vector.load %arg2[%c0_50, %67, %c0_51, %c0_52] : memref<1x18x18x192xbf16, #tpu.memory_space<vmem>>, vector<1x1x18x192xbf16>
    %69 = vector.shape_cast %68 : vector<1x1x18x192xbf16> to vector<18x192xbf16>
    %cst_53 = arith.constant dense<0.000000e+00> : vector<18x128xf32>
    %70 = tpu.matmul %69, %1, %cst_53 {dimension_numbers = #tpu.dot_dimension_numbers<[1], [0], [0], [1], [0, 0, 1, 1], [], []>} : vector<18x192xbf16>, vector<192x128xbf16>, vector<18x128xf32> -> vector<18x128xf32>
    %c8 = arith.constant 8 : index
    %c0_54 = arith.constant 0 : index
    %c0_55 = arith.constant 0 : index
    %71 = vector.load %arg8[%c8, %c0_54, %c0_55] : memref<10x18x128xf32, #tpu.memory_space<vmem>>, vector<1x18x128xf32>
    %72 = vector.shape_cast %71 : vector<1x18x128xf32> to vector<18x128xf32>
    %73 = vector.shape_cast %70 : vector<18x128xf32> to vector<1x18x128xf32>
    tpu.vector_store %arg8[%c8, %c0_54, %c0_55], %73 {strides = array<i32>} : memref<10x18x128xf32, #tpu.memory_space<vmem>>, vector<1x18x128xf32>,
    %c9_i32 = arith.constant 9 : i32
    %74 = arith.addi %0, %c9_i32 : i32
    %c0_56 = arith.constant 0 : index
    %75 = arith.index_cast %74 : i32 to index
    %c0_57 = arith.constant 0 : index
    %c0_58 = arith.constant 0 : index
    %76 = vector.load %arg2[%c0_56, %75, %c0_57, %c0_58] : memref<1x18x18x192xbf16, #tpu.memory_space<vmem>>, vector<1x1x18x192xbf16>
    %77 = vector.shape_cast %76 : vector<1x1x18x192xbf16> to vector<18x192xbf16>
    %cst_59 = arith.constant dense<0.000000e+00> : vector<18x128xf32>
    %78 = tpu.matmul %77, %1, %cst_59 {dimension_numbers = #tpu.dot_dimension_numbers<[1], [0], [0], [1], [0, 0, 1, 1], [], []>} : vector<18x192xbf16>, vector<192x128xbf16>, vector<18x128xf32> -> vector<18x128xf32>
    %c9 = arith.constant 9 : index
    %c0_60 = arith.constant 0 : index
    %c0_61 = arith.constant 0 : index
    %79 = vector.load %arg8[%c9, %c0_60, %c0_61] : memref<10x18x128xf32, #tpu.memory_space<vmem>>, vector<1x18x128xf32>
    %80 = vector.shape_cast %79 : vector<1x18x128xf32> to vector<18x128xf32>
    %81 = vector.shape_cast %78 : vector<18x128xf32> to vector<1x18x128xf32>
    tpu.vector_store %arg8[%c9, %c0_60, %c0_61], %81 {strides = array<i32>} : memref<10x18x128xf32, #tpu.memory_space<vmem>>, vector<1x18x128xf32>,
    %c0_62 = arith.constant 0 : index
    %c0_63 = arith.constant 0 : index
    %82 = vector.load %arg4[%c0_62, %c0_63] : memref<16x18xbf16, #tpu.memory_space<vmem>>, vector<16x18xbf16>
    %c0_64 = arith.constant 0 : index
    %c0_65 = arith.constant 0 : index
    %83 = vector.load %arg5[%c0_64, %c0_65] : memref<1x128xf32, #tpu.memory_space<vmem>>, vector<1x128xf32>
    %c0_66 = arith.constant 0 : index
    %c0_67 = arith.constant 0 : index
    %84 = vector.load %arg6[%c0_66, %c0_67] : memref<1x128xf32, #tpu.memory_space<vmem>>, vector<1x128xf32>
    %c0_68 = arith.constant 0 : index
    %c0_69 = arith.constant 0 : index
    %c0_70 = arith.constant 0 : index
    %85 = vector.load %arg8[%c0_68, %c0_69, %c0_70] : memref<10x18x128xf32, #tpu.memory_space<vmem>>, vector<1x18x128xf32>
    %86 = vector.shape_cast %85 : vector<1x18x128xf32> to vector<18x128xf32>
    %c1_71 = arith.constant 1 : index
    %c0_72 = arith.constant 0 : index
    %c0_73 = arith.constant 0 : index
    %87 = vector.load %arg8[%c1_71, %c0_72, %c0_73] : memref<10x18x128xf32, #tpu.memory_space<vmem>>, vector<1x18x128xf32>
    %88 = vector.shape_cast %87 : vector<1x18x128xf32> to vector<18x128xf32>
    %89 = arith.addf %86, %88 : vector<18x128xf32>
    %c2_74 = arith.constant 2 : index
    %c0_75 = arith.constant 0 : index
    %c0_76 = arith.constant 0 : index
    %90 = vector.load %arg8[%c2_74, %c0_75, %c0_76] : memref<10x18x128xf32, #tpu.memory_space<vmem>>, vector<1x18x128xf32>
    %91 = vector.shape_cast %90 : vector<1x18x128xf32> to vector<18x128xf32>
    %92 = arith.addf %89, %91 : vector<18x128xf32>
    %93 = arith.truncf %92 : vector<18x128xf32> to vector<18x128xbf16>
    %cst_77 = arith.constant dense<0.000000e+00> : vector<16x128xf32>
    %94 = tpu.matmul %82, %93, %cst_77 {dimension_numbers = #tpu.dot_dimension_numbers<[1], [0], [0], [1], [0, 0, 1, 1], [], []>} : vector<16x18xbf16>, vector<18x128xbf16>, vector<16x128xf32> -> vector<16x128xf32>
    %95 = vector.broadcast %83 : vector<1x128xf32> to vector<16x128xf32>
    %96 = arith.mulf %94, %95 : vector<16x128xf32>
    %97 = vector.broadcast %84 : vector<1x128xf32> to vector<16x128xf32>
    %98 = arith.addf %96, %97 : vector<16x128xf32>
    %cst_78 = arith.constant 0.000000e+00 : f32
    %99 = vector.broadcast %cst_78 : f32 to vector<16x128xf32>
    %100 = arith.maximumf %98, %99 : vector<16x128xf32>
    %101 = arith.truncf %100 : vector<16x128xf32> to vector<16x128xbf16>
    %c0_79 = arith.constant 0 : index
    %c0_80 = arith.constant 0 : index
    %c0_81 = arith.constant 0 : index
    %c0_82 = arith.constant 0 : index
    %102 = vector.load %arg7[%c0_79, %c0_80, %c0_81, %c0_82] : memref<1x8x16x128xbf16, #tpu.memory_space<vmem>>, vector<1x1x16x128xbf16>
    %103 = vector.shape_cast %102 : vector<1x1x16x128xbf16> to vector<16x128xbf16>
    %104 = vector.shape_cast %101 : vector<16x128xbf16> to vector<1x1x16x128xbf16>
    tpu.vector_store %arg7[%c0_79, %c0_80, %c0_81, %c0_82], %104 {strides = array<i32>} : memref<1x8x16x128xbf16, #tpu.memory_space<vmem>>, vector<1x1x16x128xbf16>,
    %c1_83 = arith.constant 1 : index
    %c0_84 = arith.constant 0 : index
    %c0_85 = arith.constant 0 : index
    %105 = vector.load %arg8[%c1_83, %c0_84, %c0_85] : memref<10x18x128xf32, #tpu.memory_space<vmem>>, vector<1x18x128xf32>
    %106 = vector.shape_cast %105 : vector<1x18x128xf32> to vector<18x128xf32>
    %c2_86 = arith.constant 2 : index
    %c0_87 = arith.constant 0 : index
    %c0_88 = arith.constant 0 : index
    %107 = vector.load %arg8[%c2_86, %c0_87, %c0_88] : memref<10x18x128xf32, #tpu.memory_space<vmem>>, vector<1x18x128xf32>
    %108 = vector.shape_cast %107 : vector<1x18x128xf32> to vector<18x128xf32>
    %109 = arith.addf %106, %108 : vector<18x128xf32>
    %c3_89 = arith.constant 3 : index
    %c0_90 = arith.constant 0 : index
    %c0_91 = arith.constant 0 : index
    %110 = vector.load %arg8[%c3_89, %c0_90, %c0_91] : memref<10x18x128xf32, #tpu.memory_space<vmem>>, vector<1x18x128xf32>
    %111 = vector.shape_cast %110 : vector<1x18x128xf32> to vector<18x128xf32>
    %112 = arith.addf %109, %111 : vector<18x128xf32>
    %113 = arith.truncf %112 : vector<18x128xf32> to vector<18x128xbf16>
    %cst_92 = arith.constant dense<0.000000e+00> : vector<16x128xf32>
    %114 = tpu.matmul %82, %113, %cst_92 {dimension_numbers = #tpu.dot_dimension_numbers<[1], [0], [0], [1], [0, 0, 1, 1], [], []>} : vector<16x18xbf16>, vector<18x128xbf16>, vector<16x128xf32> -> vector<16x128xf32>
    %115 = vector.broadcast %83 : vector<1x128xf32> to vector<16x128xf32>
    %116 = arith.mulf %114, %115 : vector<16x128xf32>
    %117 = vector.broadcast %84 : vector<1x128xf32> to vector<16x128xf32>
    %118 = arith.addf %116, %117 : vector<16x128xf32>
    %cst_93 = arith.constant 0.000000e+00 : f32
    %119 = vector.broadcast %cst_93 : f32 to vector<16x128xf32>
    %120 = arith.maximumf %118, %119 : vector<16x128xf32>
    %121 = arith.truncf %120 : vector<16x128xf32> to vector<16x128xbf16>
    %c0_94 = arith.constant 0 : index
    %c1_95 = arith.constant 1 : index
    %c0_96 = arith.constant 0 : index
    %c0_97 = arith.constant 0 : index
    %122 = vector.load %arg7[%c0_94, %c1_95, %c0_96, %c0_97] : memref<1x8x16x128xbf16, #tpu.memory_space<vmem>>, vector<1x1x16x128xbf16>
    %123 = vector.shape_cast %122 : vector<1x1x16x128xbf16> to vector<16x128xbf16>
    %124 = vector.shape_cast %121 : vector<16x128xbf16> to vector<1x1x16x128xbf16>
    tpu.vector_store %arg7[%c0_94, %c1_95, %c0_96, %c0_97], %124 {strides = array<i32>} : memref<1x8x16x128xbf16, #tpu.memory_space<vmem>>, vector<1x1x16x128xbf16>,
    %c2_98 = arith.constant 2 : index
    %c0_99 = arith.constant 0 : index
    %c0_100 = arith.constant 0 : index
    %125 = vector.load %arg8[%c2_98, %c0_99, %c0_100] : memref<10x18x128xf32, #tpu.memory_space<vmem>>, vector<1x18x128xf32>
    %126 = vector.shape_cast %125 : vector<1x18x128xf32> to vector<18x128xf32>
    %c3_101 = arith.constant 3 : index
    %c0_102 = arith.constant 0 : index
    %c0_103 = arith.constant 0 : index
    %127 = vector.load %arg8[%c3_101, %c0_102, %c0_103] : memref<10x18x128xf32, #tpu.memory_space<vmem>>, vector<1x18x128xf32>
    %128 = vector.shape_cast %127 : vector<1x18x128xf32> to vector<18x128xf32>
    %129 = arith.addf %126, %128 : vector<18x128xf32>
    %c4_104 = arith.constant 4 : index
    %c0_105 = arith.constant 0 : index
    %c0_106 = arith.constant 0 : index
    %130 = vector.load %arg8[%c4_104, %c0_105, %c0_106] : memref<10x18x128xf32, #tpu.memory_space<vmem>>, vector<1x18x128xf32>
    %131 = vector.shape_cast %130 : vector<1x18x128xf32> to vector<18x128xf32>
    %132 = arith.addf %129, %131 : vector<18x128xf32>
    %133 = arith.truncf %132 : vector<18x128xf32> to vector<18x128xbf16>
    %cst_107 = arith.constant dense<0.000000e+00> : vector<16x128xf32>
    %134 = tpu.matmul %82, %133, %cst_107 {dimension_numbers = #tpu.dot_dimension_numbers<[1], [0], [0], [1], [0, 0, 1, 1], [], []>} : vector<16x18xbf16>, vector<18x128xbf16>, vector<16x128xf32> -> vector<16x128xf32>
    %135 = vector.broadcast %83 : vector<1x128xf32> to vector<16x128xf32>
    %136 = arith.mulf %134, %135 : vector<16x128xf32>
    %137 = vector.broadcast %84 : vector<1x128xf32> to vector<16x128xf32>
    %138 = arith.addf %136, %137 : vector<16x128xf32>
    %cst_108 = arith.constant 0.000000e+00 : f32
    %139 = vector.broadcast %cst_108 : f32 to vector<16x128xf32>
    %140 = arith.maximumf %138, %139 : vector<16x128xf32>
    %141 = arith.truncf %140 : vector<16x128xf32> to vector<16x128xbf16>
    %c0_109 = arith.constant 0 : index
    %c2_110 = arith.constant 2 : index
    %c0_111 = arith.constant 0 : index
    %c0_112 = arith.constant 0 : index
    %142 = vector.load %arg7[%c0_109, %c2_110, %c0_111, %c0_112] : memref<1x8x16x128xbf16, #tpu.memory_space<vmem>>, vector<1x1x16x128xbf16>
    %143 = vector.shape_cast %142 : vector<1x1x16x128xbf16> to vector<16x128xbf16>
    %144 = vector.shape_cast %141 : vector<16x128xbf16> to vector<1x1x16x128xbf16>
    tpu.vector_store %arg7[%c0_109, %c2_110, %c0_111, %c0_112], %144 {strides = array<i32>} : memref<1x8x16x128xbf16, #tpu.memory_space<vmem>>, vector<1x1x16x128xbf16>,
    %c3_113 = arith.constant 3 : index
    %c0_114 = arith.constant 0 : index
    %c0_115 = arith.constant 0 : index
    %145 = vector.load %arg8[%c3_113, %c0_114, %c0_115] : memref<10x18x128xf32, #tpu.memory_space<vmem>>, vector<1x18x128xf32>
    %146 = vector.shape_cast %145 : vector<1x18x128xf32> to vector<18x128xf32>
    %c4_116 = arith.constant 4 : index
    %c0_117 = arith.constant 0 : index
    %c0_118 = arith.constant 0 : index
    %147 = vector.load %arg8[%c4_116, %c0_117, %c0_118] : memref<10x18x128xf32, #tpu.memory_space<vmem>>, vector<1x18x128xf32>
    %148 = vector.shape_cast %147 : vector<1x18x128xf32> to vector<18x128xf32>
    %149 = arith.addf %146, %148 : vector<18x128xf32>
    %c5_119 = arith.constant 5 : index
    %c0_120 = arith.constant 0 : index
    %c0_121 = arith.constant 0 : index
    %150 = vector.load %arg8[%c5_119, %c0_120, %c0_121] : memref<10x18x128xf32, #tpu.memory_space<vmem>>, vector<1x18x128xf32>
    %151 = vector.shape_cast %150 : vector<1x18x128xf32> to vector<18x128xf32>
    %152 = arith.addf %149, %151 : vector<18x128xf32>
    %153 = arith.truncf %152 : vector<18x128xf32> to vector<18x128xbf16>
    %cst_122 = arith.constant dense<0.000000e+00> : vector<16x128xf32>
    %154 = tpu.matmul %82, %153, %cst_122 {dimension_numbers = #tpu.dot_dimension_numbers<[1], [0], [0], [1], [0, 0, 1, 1], [], []>} : vector<16x18xbf16>, vector<18x128xbf16>, vector<16x128xf32> -> vector<16x128xf32>
    %155 = vector.broadcast %83 : vector<1x128xf32> to vector<16x128xf32>
    %156 = arith.mulf %154, %155 : vector<16x128xf32>
    %157 = vector.broadcast %84 : vector<1x128xf32> to vector<16x128xf32>
    %158 = arith.addf %156, %157 : vector<16x128xf32>
    %cst_123 = arith.constant 0.000000e+00 : f32
    %159 = vector.broadcast %cst_123 : f32 to vector<16x128xf32>
    %160 = arith.maximumf %158, %159 : vector<16x128xf32>
    %161 = arith.truncf %160 : vector<16x128xf32> to vector<16x128xbf16>
    %c0_124 = arith.constant 0 : index
    %c3_125 = arith.constant 3 : index
    %c0_126 = arith.constant 0 : index
    %c0_127 = arith.constant 0 : index
    %162 = vector.load %arg7[%c0_124, %c3_125, %c0_126, %c0_127] : memref<1x8x16x128xbf16, #tpu.memory_space<vmem>>, vector<1x1x16x128xbf16>
    %163 = vector.shape_cast %162 : vector<1x1x16x128xbf16> to vector<16x128xbf16>
    %164 = vector.shape_cast %161 : vector<16x128xbf16> to vector<1x1x16x128xbf16>
    tpu.vector_store %arg7[%c0_124, %c3_125, %c0_126, %c0_127], %164 {strides = array<i32>} : memref<1x8x16x128xbf16, #tpu.memory_space<vmem>>, vector<1x1x16x128xbf16>,
    %c4_128 = arith.constant 4 : index
    %c0_129 = arith.constant 0 : index
    %c0_130 = arith.constant 0 : index
    %165 = vector.load %arg8[%c4_128, %c0_129, %c0_130] : memref<10x18x128xf32, #tpu.memory_space<vmem>>, vector<1x18x128xf32>
    %166 = vector.shape_cast %165 : vector<1x18x128xf32> to vector<18x128xf32>
    %c5_131 = arith.constant 5 : index
    %c0_132 = arith.constant 0 : index
    %c0_133 = arith.constant 0 : index
    %167 = vector.load %arg8[%c5_131, %c0_132, %c0_133] : memref<10x18x128xf32, #tpu.memory_space<vmem>>, vector<1x18x128xf32>
    %168 = vector.shape_cast %167 : vector<1x18x128xf32> to vector<18x128xf32>
    %169 = arith.addf %166, %168 : vector<18x128xf32>
    %c6_134 = arith.constant 6 : index
    %c0_135 = arith.constant 0 : index
    %c0_136 = arith.constant 0 : index
    %170 = vector.load %arg8[%c6_134, %c0_135, %c0_136] : memref<10x18x128xf32, #tpu.memory_space<vmem>>, vector<1x18x128xf32>
    %171 = vector.shape_cast %170 : vector<1x18x128xf32> to vector<18x128xf32>
    %172 = arith.addf %169, %171 : vector<18x128xf32>
    %173 = arith.truncf %172 : vector<18x128xf32> to vector<18x128xbf16>
    %cst_137 = arith.constant dense<0.000000e+00> : vector<16x128xf32>
    %174 = tpu.matmul %82, %173, %cst_137 {dimension_numbers = #tpu.dot_dimension_numbers<[1], [0], [0], [1], [0, 0, 1, 1], [], []>} : vector<16x18xbf16>, vector<18x128xbf16>, vector<16x128xf32> -> vector<16x128xf32>
    %175 = vector.broadcast %83 : vector<1x128xf32> to vector<16x128xf32>
    %176 = arith.mulf %174, %175 : vector<16x128xf32>
    %177 = vector.broadcast %84 : vector<1x128xf32> to vector<16x128xf32>
    %178 = arith.addf %176, %177 : vector<16x128xf32>
    %cst_138 = arith.constant 0.000000e+00 : f32
    %179 = vector.broadcast %cst_138 : f32 to vector<16x128xf32>
    %180 = arith.maximumf %178, %179 : vector<16x128xf32>
    %181 = arith.truncf %180 : vector<16x128xf32> to vector<16x128xbf16>
    %c0_139 = arith.constant 0 : index
    %c4_140 = arith.constant 4 : index
    %c0_141 = arith.constant 0 : index
    %c0_142 = arith.constant 0 : index
    %182 = vector.load %arg7[%c0_139, %c4_140, %c0_141, %c0_142] : memref<1x8x16x128xbf16, #tpu.memory_space<vmem>>, vector<1x1x16x128xbf16>
    %183 = vector.shape_cast %182 : vector<1x1x16x128xbf16> to vector<16x128xbf16>
    %184 = vector.shape_cast %181 : vector<16x128xbf16> to vector<1x1x16x128xbf16>
    tpu.vector_store %arg7[%c0_139, %c4_140, %c0_141, %c0_142], %184 {strides = array<i32>} : memref<1x8x16x128xbf16, #tpu.memory_space<vmem>>, vector<1x1x16x128xbf16>,
    %c5_143 = arith.constant 5 : index
    %c0_144 = arith.constant 0 : index
    %c0_145 = arith.constant 0 : index
    %185 = vector.load %arg8[%c5_143, %c0_144, %c0_145] : memref<10x18x128xf32, #tpu.memory_space<vmem>>, vector<1x18x128xf32>
    %186 = vector.shape_cast %185 : vector<1x18x128xf32> to vector<18x128xf32>
    %c6_146 = arith.constant 6 : index
    %c0_147 = arith.constant 0 : index
    %c0_148 = arith.constant 0 : index
    %187 = vector.load %arg8[%c6_146, %c0_147, %c0_148] : memref<10x18x128xf32, #tpu.memory_space<vmem>>, vector<1x18x128xf32>
    %188 = vector.shape_cast %187 : vector<1x18x128xf32> to vector<18x128xf32>
    %189 = arith.addf %186, %188 : vector<18x128xf32>
    %c7_149 = arith.constant 7 : index
    %c0_150 = arith.constant 0 : index
    %c0_151 = arith.constant 0 : index
    %190 = vector.load %arg8[%c7_149, %c0_150, %c0_151] : memref<10x18x128xf32, #tpu.memory_space<vmem>>, vector<1x18x128xf32>
    %191 = vector.shape_cast %190 : vector<1x18x128xf32> to vector<18x128xf32>
    %192 = arith.addf %189, %191 : vector<18x128xf32>
    %193 = arith.truncf %192 : vector<18x128xf32> to vector<18x128xbf16>
    %cst_152 = arith.constant dense<0.000000e+00> : vector<16x128xf32>
    %194 = tpu.matmul %82, %193, %cst_152 {dimension_numbers = #tpu.dot_dimension_numbers<[1], [0], [0], [1], [0, 0, 1, 1], [], []>} : vector<16x18xbf16>, vector<18x128xbf16>, vector<16x128xf32> -> vector<16x128xf32>
    %195 = vector.broadcast %83 : vector<1x128xf32> to vector<16x128xf32>
    %196 = arith.mulf %194, %195 : vector<16x128xf32>
    %197 = vector.broadcast %84 : vector<1x128xf32> to vector<16x128xf32>
    %198 = arith.addf %196, %197 : vector<16x128xf32>
    %cst_153 = arith.constant 0.000000e+00 : f32
    %199 = vector.broadcast %cst_153 : f32 to vector<16x128xf32>
    %200 = arith.maximumf %198, %199 : vector<16x128xf32>
    %201 = arith.truncf %200 : vector<16x128xf32> to vector<16x128xbf16>
    %c0_154 = arith.constant 0 : index
    %c5_155 = arith.constant 5 : index
    %c0_156 = arith.constant 0 : index
    %c0_157 = arith.constant 0 : index
    %202 = vector.load %arg7[%c0_154, %c5_155, %c0_156, %c0_157] : memref<1x8x16x128xbf16, #tpu.memory_space<vmem>>, vector<1x1x16x128xbf16>
    %203 = vector.shape_cast %202 : vector<1x1x16x128xbf16> to vector<16x128xbf16>
    %204 = vector.shape_cast %201 : vector<16x128xbf16> to vector<1x1x16x128xbf16>
    tpu.vector_store %arg7[%c0_154, %c5_155, %c0_156, %c0_157], %204 {strides = array<i32>} : memref<1x8x16x128xbf16, #tpu.memory_space<vmem>>, vector<1x1x16x128xbf16>,
    %c6_158 = arith.constant 6 : index
    %c0_159 = arith.constant 0 : index
    %c0_160 = arith.constant 0 : index
    %205 = vector.load %arg8[%c6_158, %c0_159, %c0_160] : memref<10x18x128xf32, #tpu.memory_space<vmem>>, vector<1x18x128xf32>
    %206 = vector.shape_cast %205 : vector<1x18x128xf32> to vector<18x128xf32>
    %c7_161 = arith.constant 7 : index
    %c0_162 = arith.constant 0 : index
    %c0_163 = arith.constant 0 : index
    %207 = vector.load %arg8[%c7_161, %c0_162, %c0_163] : memref<10x18x128xf32, #tpu.memory_space<vmem>>, vector<1x18x128xf32>
    %208 = vector.shape_cast %207 : vector<1x18x128xf32> to vector<18x128xf32>
    %209 = arith.addf %206, %208 : vector<18x128xf32>
    %c8_164 = arith.constant 8 : index
    %c0_165 = arith.constant 0 : index
    %c0_166 = arith.constant 0 : index
    %210 = vector.load %arg8[%c8_164, %c0_165, %c0_166] : memref<10x18x128xf32, #tpu.memory_space<vmem>>, vector<1x18x128xf32>
    %211 = vector.shape_cast %210 : vector<1x18x128xf32> to vector<18x128xf32>
    %212 = arith.addf %209, %211 : vector<18x128xf32>
    %213 = arith.truncf %212 : vector<18x128xf32> to vector<18x128xbf16>
    %cst_167 = arith.constant dense<0.000000e+00> : vector<16x128xf32>
    %214 = tpu.matmul %82, %213, %cst_167 {dimension_numbers = #tpu.dot_dimension_numbers<[1], [0], [0], [1], [0, 0, 1, 1], [], []>} : vector<16x18xbf16>, vector<18x128xbf16>, vector<16x128xf32> -> vector<16x128xf32>
    %215 = vector.broadcast %83 : vector<1x128xf32> to vector<16x128xf32>
    %216 = arith.mulf %214, %215 : vector<16x128xf32>
    %217 = vector.broadcast %84 : vector<1x128xf32> to vector<16x128xf32>
    %218 = arith.addf %216, %217 : vector<16x128xf32>
    %cst_168 = arith.constant 0.000000e+00 : f32
    %219 = vector.broadcast %cst_168 : f32 to vector<16x128xf32>
    %220 = arith.maximumf %218, %219 : vector<16x128xf32>
    %221 = arith.truncf %220 : vector<16x128xf32> to vector<16x128xbf16>
    %c0_169 = arith.constant 0 : index
    %c6_170 = arith.constant 6 : index
    %c0_171 = arith.constant 0 : index
    %c0_172 = arith.constant 0 : index
    %222 = vector.load %arg7[%c0_169, %c6_170, %c0_171, %c0_172] : memref<1x8x16x128xbf16, #tpu.memory_space<vmem>>, vector<1x1x16x128xbf16>
    %223 = vector.shape_cast %222 : vector<1x1x16x128xbf16> to vector<16x128xbf16>
    %224 = vector.shape_cast %221 : vector<16x128xbf16> to vector<1x1x16x128xbf16>
    tpu.vector_store %arg7[%c0_169, %c6_170, %c0_171, %c0_172], %224 {strides = array<i32>} : memref<1x8x16x128xbf16, #tpu.memory_space<vmem>>, vector<1x1x16x128xbf16>,
    %c7_173 = arith.constant 7 : index
    %c0_174 = arith.constant 0 : index
    %c0_175 = arith.constant 0 : index
    %225 = vector.load %arg8[%c7_173, %c0_174, %c0_175] : memref<10x18x128xf32, #tpu.memory_space<vmem>>, vector<1x18x128xf32>
    %226 = vector.shape_cast %225 : vector<1x18x128xf32> to vector<18x128xf32>
    %c8_176 = arith.constant 8 : index
    %c0_177 = arith.constant 0 : index
    %c0_178 = arith.constant 0 : index
    %227 = vector.load %arg8[%c8_176, %c0_177, %c0_178] : memref<10x18x128xf32, #tpu.memory_space<vmem>>, vector<1x18x128xf32>
    %228 = vector.shape_cast %227 : vector<1x18x128xf32> to vector<18x128xf32>
    %229 = arith.addf %226, %228 : vector<18x128xf32>
    %c9_179 = arith.constant 9 : index
    %c0_180 = arith.constant 0 : index
    %c0_181 = arith.constant 0 : index
    %230 = vector.load %arg8[%c9_179, %c0_180, %c0_181] : memref<10x18x128xf32, #tpu.memory_space<vmem>>, vector<1x18x128xf32>
    %231 = vector.shape_cast %230 : vector<1x18x128xf32> to vector<18x128xf32>
    %232 = arith.addf %229, %231 : vector<18x128xf32>
    %233 = arith.truncf %232 : vector<18x128xf32> to vector<18x128xbf16>
    %cst_182 = arith.constant dense<0.000000e+00> : vector<16x128xf32>
    %234 = tpu.matmul %82, %233, %cst_182 {dimension_numbers = #tpu.dot_dimension_numbers<[1], [0], [0], [1], [0, 0, 1, 1], [], []>} : vector<16x18xbf16>, vector<18x128xbf16>, vector<16x128xf32> -> vector<16x128xf32>
    %235 = vector.broadcast %83 : vector<1x128xf32> to vector<16x128xf32>
    %236 = arith.mulf %234, %235 : vector<16x128xf32>
    %237 = vector.broadcast %84 : vector<1x128xf32> to vector<16x128xf32>
    %238 = arith.addf %236, %237 : vector<16x128xf32>
    %cst_183 = arith.constant 0.000000e+00 : f32
    %239 = vector.broadcast %cst_183 : f32 to vector<16x128xf32>
    %240 = arith.maximumf %238, %239 : vector<16x128xf32>
    %241 = arith.truncf %240 : vector<16x128xf32> to vector<16x128xbf16>
    %c0_184 = arith.constant 0 : index
    %c7_185 = arith.constant 7 : index
    %c0_186 = arith.constant 0 : index
    %c0_187 = arith.constant 0 : index
    %242 = vector.load %arg7[%c0_184, %c7_185, %c0_186, %c0_187] : memref<1x8x16x128xbf16, #tpu.memory_space<vmem>>, vector<1x1x16x128xbf16>
    %243 = vector.shape_cast %242 : vector<1x1x16x128xbf16> to vector<16x128xbf16>
    %244 = vector.shape_cast %241 : vector<16x128xbf16> to vector<1x1x16x128xbf16>
    tpu.vector_store %arg7[%c0_184, %c7_185, %c0_186, %c0_187], %244 {strides = array<i32>} : memref<1x8x16x128xbf16, #tpu.memory_space<vmem>>, vector<1x1x16x128xbf16>,
    return
  }
  func.func @transform_0(%arg0: i32, %arg1: i32) -> (i32, i32, i32, i32) {
    %c0_i32 = arith.constant 0 : i32
    %c0_i32_0 = arith.constant 0 : i32
    %c0_i32_1 = arith.constant 0 : i32
    %c0_i32_2 = arith.constant 0 : i32
    return %arg0, %c0_i32, %c0_i32_0, %c0_i32_1 : i32, i32, i32, i32
  }
  func.func @transform_1(%arg0: i32, %arg1: i32) -> (i32, i32) {
    %c0_i32 = arith.constant 0 : i32
    %c0_i32_0 = arith.constant 0 : i32
    %c0_i32_1 = arith.constant 0 : i32
    return %c0_i32, %c0_i32_0 : i32, i32
  }
  func.func @transform_2(%arg0: i32, %arg1: i32) -> (i32, i32) {
    %c0_i32 = arith.constant 0 : i32
    %c0_i32_0 = arith.constant 0 : i32
    %c0_i32_1 = arith.constant 0 : i32
    return %c0_i32, %c0_i32_0 : i32, i32
  }
  func.func @transform_3(%arg0: i32, %arg1: i32) -> (i32, i32) {
    %c0_i32 = arith.constant 0 : i32
    %c0_i32_0 = arith.constant 0 : i32
    %c0_i32_1 = arith.constant 0 : i32
    return %c0_i32, %c0_i32_0 : i32, i32
  }
  func.func @transform_4(%arg0: i32, %arg1: i32) -> (i32, i32) {
    %c0_i32 = arith.constant 0 : i32
    %c0_i32_0 = arith.constant 0 : i32
    %c0_i32_1 = arith.constant 0 : i32
    return %c0_i32, %c0_i32_0 : i32, i32
  }
  func.func @transform_5(%arg0: i32, %arg1: i32) -> (i32, i32, i32, i32) {
    %c0_i32 = arith.constant 0 : i32
    %c0_i32_0 = arith.constant 0 : i32
    %c0_i32_1 = arith.constant 0 : i32
    return %arg0, %arg1, %c0_i32, %c0_i32_0 : i32, i32, i32, i32
  }
}

</mosaic_0001>

<bundles_post_ra>
// kernel: _lambda_.1
= control target key start
LH: loop header
LB: loop body
LE: loop exit
PB: predicated region body
PF: predicated region fallthrough
CT: control target
= control target key end

     0   :  { %s2429_s18 = smov 0   ;;  %s2431_s19 = smov 0   ;;  %s2953_s0 = inlined_call_operand.vmem [shape: bf16[2,18,18,192], index: 0, kind: input, shape index: {}]   ;;  %s2954_s1 = inlined_call_operand.vmem [shape: bf16[192,128], index: 1, kind: input, shape index: {}]   ;;  %s2955_s2 = inlined_call_operand.vmem [shape: bf16[16,18], index: 2, kind: input, shape index: {}]   ;;  %s2956_s3 = inlined_call_operand.vmem [shape: f32[1,128], index: 3, kind: input, shape index: {}]   ;;  %s2957_s4 = inlined_call_operand.vmem [shape: f32[1,128], index: 4, kind: input, shape index: {}]   ;;  %s2958_s5 = inlined_call_operand.vmem [shape: bf16[2,16,16,128], index: 5, kind: output, shape index: {}]  }
   0x1   :  { %s2433_s20 = smov 0   ;;  %s2435_s21 = smov 0  }
   0x2   :  { %s2437_s22 = smov 0  }
   0x3 LB: > { %s24_s23 = sadd.s32 1, %s2386_s20  ;;  %s27_s24 = sadd.s32 1, %s2390_s21  ;;  %s2394_s22 = sphi %s2437_s22, %s15_s22   ;;  %s2390_s21 = sphi %s2435_s21, %s2962_s21   ;;  %s2386_s20 = sphi %s2433_s20, %s2961_s20   ;;  %s2382_s19 = sphi %s2431_s19, %s2960_s19   ;;  %s2378_s18 = sphi %s2429_s18, %s2959_s18  }
   0x4   : > { %p25_p0 = scmp.ge.s32.totalorder %s24_s23, 2  ;;  %p1928_p1 = scmp.ge.s32.totalorder %s2394_s22, 1 }
   0x5   : > { %p201_p2 = scmp.lt.s32.totalorder %s2394_s22, 5 }
   0x6   : > { %s2964_s23 = smov (%p25_p0, %s24_s23), 0  ;;  %s2966_s24 = smov (!%p25_p0, %s27_s24), %s2390_s21 }
   0x7   : > { %p202_p3 = pnand %p1928_p1, %p201_p2  ;;  %p29_p4 = scmp.ge.s32.totalorder %s2966_s24, 2 }
   0x8   : > { %v2464_v0 = vld [vmem:[%s2954_s1] sm:$0xff] (!%p202_p3)   ;;  %v2396_v1 = vmov (!%p202_p3), 0   ;;  %p234_p5 = scmp.lt.s32.totalorder (!%p202_p3), %s2382_s19, 1  ;;  %v2473_v2 = vld [vmem:[%s2954_s1 + $0x8] sm:$0xff] (!%p202_p3)   ;;  %v2485_v3 = vld [vmem:[%s2954_s1 + $0x10] sm:$0xff] (!%p202_p3)   ;;  %s2097_s7 = smul.u32 (!%p202_p3), 192, %s2378_s18 }
   0x9   : > { %s2968_s24 = smov (%p29_p4, %s2966_s24), 0  ;;  %205 = sbr.rel (%p202_p3) target bundleno = 712 (0x2c8), region = 40 }
   0xa   : > { %376 = vmatprep.subr.bf16.mxu0 (!%p202_p3), %v2396_v1  ;;  %455 = vmatprep.subr.bf16.mxu1 (!%p202_p3), %v2396_v1  ;;  %v2498_v4 = vld [vmem:[%s2954_s1 + $0x18] sm:$0xff] (!%p202_p3)   ;;  %vm369_vm0 = vcmask (!%p202_p3), 523264   ;;  %v2510_v6 = vld [vmem:[%s2954_s1 + $0x20] sm:$0xff] (!%p202_p3)   ;;  %v2522_v8 = vld [vmem:[%s2954_s1 + $0x28] sm:$0xff] (!%p202_p3)   ;;  %v2397_v61 = vmov (!%p202_p3), 0.0   ;;  %vm2398_vm1 = vmmov (!%p202_p3), 0  }
   0xb   : > { %377 = vmatpush1.bf16.msra.mxu0 (!%p202_p3), %v2464_v0  ;;  %456 = vmatpush1.bf16.msra.mxu1 (!%p202_p3), %v2464_v0  ;;  %v2529_v9 = vld [vmem:[%s2954_s1 + $0x30] sm:$0xff] (!%p202_p3)   ;;  %v2540_v10 = vld [vmem:[%s2954_s1 + $0x38] sm:$0xff] (!%p202_p3)   ;;  %v2549_v11 = vld [vmem:[%s2954_s1 + $0x40] sm:$0xff] (!%p202_p3)   ;;  %vm1177_vm2 = vcmask (!%p202_p3), 1040384   ;;  %vm1173_vm3 = vcmask (!%p202_p3), 146432   ;;  %s1930_s14 = sshll.u32 (!%p202_p3), %s2378_s18, 3 }
   0xc   : > { %378 = vmatprep.subr.bf16.mxu0 (!%p202_p3), %v2396_v1  ;;  %457 = vmatprep.subr.bf16.mxu1 (!%p202_p3), %v2396_v1  ;;  %v2558_v12 = vld [vmem:[%s2954_s1 + $0x48] sm:$0xff] (!%p202_p3)   ;;  %v2567_v13 = vld [vmem:[%s2954_s1 + $0x50] sm:$0xff] (!%p202_p3)   ;;  %v2576_v14 = vld [vmem:[%s2954_s1 + $0x58] sm:$0xff] (!%p202_p3)   ;;  %p242_p6 = scmp.lt.s32.totalorder (!%p202_p3), %s1930_s14, 15 }
   0xf   : > { %379 = vmatpush1.bf16.msra.mxu0 (!%p202_p3), %v2473_v2  ;;  %458 = vmatpush1.bf16.msra.mxu1 (!%p202_p3), %v2473_v2 }
  0x10   : > { %s2970_s19 = smov (!%p234_p5, %s2382_s19), 1  ;;  %380 = vmatprep.subr.bf16.mxu0 %v2396_v1  ;;  %459 = vmatprep.subr.bf16.mxu1 %v2396_v1  ;;  %s2972_s14 = smov (!%p242_p6, %s1930_s14), 15 }
  0x11   : > { %s2249_s29 = smul.u32 432, %s2970_s19  ;;  %s1931_s17 = sshll.u32 %s2972_s14, 1 }
  0x12   : > { %s1932_s25 = sshll.u32 %s2970_s19, 5 }
  0x13   : > { %s238_s10 = scalar_lea.vmem %s2953_s0, %s2249_s29  ;;  %381 = vmatpush1.bf16.msra.mxu0 %v2485_v3  ;;  %460 = vmatpush1.bf16.msra.mxu1 %v2485_v3  ;;  %s246_s18 = sadd.s32 %s1932_s25, %s1931_s17 }
  0x14   : > { %s2500_s13 = scalar_lea.vmem %s238_s10, %s2097_s7  ;;  %382 = vmatprep.subr.bf16.mxu0 %v2396_v1  ;;  %461 = vmatprep.subr.bf16.mxu1 %v2396_v1  ;;  %s1933_s19 = sshll.u32 %s246_s18, 2 }
  0x15   : > { %v2307_v5 = vld [vmem:[%s2500_s13 + $0x4] ss:$8 sps:$4 sm:$0xff]   ;;  %v2305_v15 = vld [vmem:[%s2500_s13] ss:$8 sps:$4 sm:$0xff]   ;;  %v281_v17 = vld [vmem:[%s2500_s13 + $0x10] sm:$0x11]  ;;  %s2904_s30 = scalar_lea.vmem %s2958_s5, %s1933_s19 }
  0x16   : > { %v2310_v7 = vld [vmem:[%s2500_s13 + $0x1c] ss:$8 sps:$4 sm:$0xff]   ;;  %1953 = vmatprep.mubr.msk.bf16.mxu0 %vm369_vm0, %v2307_v5  ;;  %v2308_v16 = vld [vmem:[%s2500_s13 + $0x18] ss:$8 sps:$4 sm:$0xff]   ;;  %v1959_v18 = vld [vmem:[%s2500_s13 + $0x28] sm:$0x11]  ;;  %v1940_v19 = vcombine.high %v281_v17, %v281_v17  ;;  %v1939_v21 = vcombine.low %v281_v17, %v281_v17 }
  0x17   : > { %383 = vmatpush1.bf16.msra.mxu0 %v2498_v4  ;;  %462 = vmatpush1.bf16.msra.mxu1 %v2498_v4  ;;  %v1963_v20 = vcombine.high %v1959_v18, %v1959_v18  ;;  %v1962_v22 = vcombine.low %v1959_v18, %v1959_v18  ;;  %v2317_v23 = vld [vmem:[%s2500_s13 + $0x34] ss:$8 sps:$4 sm:$0xff]   ;;  %v2315_v25 = vld [vmem:[%s2500_s13 + $0x30] ss:$8 sps:$4 sm:$0xff]   ;;  %v1970_v27 = vld [vmem:[%s2500_s13 + $0x40] sm:$0x11] }
  0x18   : > { %384 = vmatprep.subr.bf16.mxu0 %v2396_v1  ;;  %463 = vmatprep.subr.bf16.mxu1 %v2396_v1  ;;  %v2320_v24 = vld [vmem:[%s2500_s13 + $0x4c] ss:$8 sps:$4 sm:$0xff]   ;;  %v2318_v26 = vld [vmem:[%s2500_s13 + $0x48] ss:$8 sps:$4 sm:$0xff]   ;;  %v1981_v28 = vld [vmem:[%s2500_s13 + $0x58] sm:$0x11]  ;;  %v1974_v29 = vcombine.high %v1970_v27, %v1970_v27  ;;  %v1973_v31 = vcombine.low %v1970_v27, %v1970_v27 }
  0x19   : > { %1964 = vmatprep.mubr.msk.bf16.mxu1 %vm369_vm0, %v2310_v7  ;;  %v1985_v30 = vcombine.high %v1981_v28, %v1981_v28  ;;  %v1984_v32 = vcombine.low %v1981_v28, %v1981_v28  ;;  %v2327_v33 = vld [vmem:[%s2500_s13 + $0x64] ss:$8 sps:$4 sm:$0xff]   ;;  %v2325_v35 = vld [vmem:[%s2500_s13 + $0x60] ss:$8 sps:$4 sm:$0xff]   ;;  %v1992_v37 = vld [vmem:[%s2500_s13 + $0x70] sm:$0x11] }
  0x1a   : > { %v2330_v34 = vld [vmem:[%s2500_s13 + $0x7c] ss:$8 sps:$4 sm:$0xff]   ;;  %v2328_v36 = vld [vmem:[%s2500_s13 + $0x78] ss:$8 sps:$4 sm:$0xff]   ;;  %v2003_v38 = vld [vmem:[%s2500_s13 + $0x88] sm:$0x11]  ;;  %v1996_v39 = vcombine.high %v1992_v37, %v1992_v37  ;;  %v1995_v41 = vcombine.low %v1992_v37, %v1992_v37 }
  0x1b   : > { %385 = vmatpush1.bf16.msra.mxu0 %v2510_v6  ;;  %464 = vmatpush1.bf16.msra.mxu1 %v2510_v6  ;;  %v2007_v40 = vcombine.high %v2003_v38, %v2003_v38  ;;  %v2006_v42 = vcombine.low %v2003_v38, %v2003_v38  ;;  %v2337_v43 = vld [vmem:[%s2500_s13 + $0x94] ss:$8 sps:$4 sm:$0xff]   ;;  %v2335_v45 = vld [vmem:[%s2500_s13 + $0x90] ss:$8 sps:$4 sm:$0xff]   ;;  %v2014_v47 = vld [vmem:[%s2500_s13 + $0xa0] sm:$0x11] }
  0x1c   : > { %386 = vmatprep.subr.bf16.mxu0 %v2396_v1  ;;  %465 = vmatprep.subr.bf16.mxu1 %v2396_v1  ;;  %v2340_v44 = vld [vmem:[%s2500_s13 + $0xac] ss:$8 sps:$4 sm:$0xff]   ;;  %v2338_v46 = vld [vmem:[%s2500_s13 + $0xa8] ss:$8 sps:$4 sm:$0xff]   ;;  %v2025_v48 = vld [vmem:[%s2500_s13 + $0xb8] sm:$0x11]  ;;  %v2018_v49 = vcombine.high %v2014_v47, %v2014_v47  ;;  %v2017_v51 = vcombine.low %v2014_v47, %v2014_v47 }
  0x1d   : > { %v2029_v50 = vcombine.high %v2025_v48, %v2025_v48  ;;  %v2028_v52 = vcombine.low %v2025_v48, %v2025_v48  ;;  %v2347_v53 = vld [vmem:[%s2500_s13 + $0xc4] ss:$8 sps:$4 sm:$0xff]   ;;  %v2036_v55 = vld [vmem:[%s2500_s13 + $0xd0] sm:$0x11]  ;;  %v2345_v57 = vld [vmem:[%s2500_s13 + $0xc0] ss:$8 sps:$4 sm:$0xff]  }
  0x1e   : > { %v2350_v54 = vld [vmem:[%s2500_s13 + $0xdc] ss:$8 sps:$4 sm:$0xff]   ;;  %v2047_v56 = vld [vmem:[%s2500_s13 + $0xe8] sm:$0x11]  ;;  %v2348_v58 = vld [vmem:[%s2500_s13 + $0xd8] ss:$8 sps:$4 sm:$0xff]   ;;  %v2040_v59 = vcombine.high %v2036_v55, %v2036_v55  ;;  %v2039_v62 = vcombine.low %v2036_v55, %v2036_v55 }
  0x1f   : > { %387 = vmatpush1.bf16.msra.mxu0 %v2522_v8  ;;  %466 = vmatpush1.bf16.msra.mxu1 %v2522_v8  ;;  %v2051_v60 = vcombine.high %v2047_v56, %v2047_v56  ;;  %v2050_v63 = vcombine.low %v2047_v56, %v2047_v56 }
  0x20   : > { %388 = vmatprep.subr.bf16.mxu0 %v2396_v1  ;;  %467 = vmatprep.subr.bf16.mxu1 %v2396_v1 }
  0x23   : > { %389 = vmatpush1.bf16.msra.mxu0 %v2529_v9  ;;  %468 = vmatpush1.bf16.msra.mxu1 %v2529_v9 }
  0x24   : > { %390 = vmatprep.subr.bf16.mxu0 %v2396_v1  ;;  %469 = vmatprep.subr.bf16.mxu1 %v2396_v1 }
  0x27   : > { %391 = vmatpush1.bf16.msra.mxu0 %v2540_v10  ;;  %470 = vmatpush1.bf16.msra.mxu1 %v2540_v10 }
  0x28   : > { %392 = vmatprep.subr.bf16.mxu0 %v2396_v1  ;;  %471 = vmatprep.subr.bf16.mxu1 %v2396_v1 }
  0x2b   : > { %393 = vmatpush1.bf16.msra.mxu0 %v2549_v11  ;;  %472 = vmatpush1.bf16.msra.mxu1 %v2549_v11 }
  0x2c   : > { %394 = vmatprep.subr.bf16.mxu0 %v2396_v1  ;;  %473 = vmatprep.subr.bf16.mxu1 %v2396_v1 }
  0x2f   : > { %395 = vmatpush1.bf16.msra.mxu0 %v2558_v12  ;;  %474 = vmatpush1.bf16.msra.mxu1 %v2558_v12 }
  0x30   : > { %396 = vmatprep.subr.bf16.mxu0 %v2396_v1  ;;  %475 = vmatprep.subr.bf16.mxu1 %v2396_v1 }
  0x33   : > { %397 = vmatpush1.bf16.msra.mxu0 %v2567_v13  ;;  %476 = vmatpush1.bf16.msra.mxu1 %v2567_v13 }
  0x34   : > { %398 = vmatprep.subr.bf16.mxu0 %v2396_v1  ;;  %477 = vmatprep.subr.bf16.mxu1 %v2396_v1 }
  0x37   : > { %399 = vmatpush1.bf16.msra.mxu0 %v2576_v14  ;;  %478 = vmatpush1.bf16.msra.mxu1 %v2576_v14 }
  0x38   : > { %535 = vmatprep.subr.bf16.mxu0 %v2396_v1  ;;  %615 = vmatprep.subr.bf16.mxu1 %v2396_v1 }
  0x3a   : > { %409 = vmatmul.mubr.bf16.vlgmr.msra.gmra.mrb[0].mxu0 %v2305_v15  ;;  %488 = vmatmul.mubr.bf16.vlgmr.msra.gmra.mrb[0].mxu1 %v2308_v16 }
  0x3b   : > { %536 = vmatpush1.bf16.msra.mxu0 %v2464_v0  ;;  %616 = vmatpush1.bf16.msra.mxu1 %v2464_v0 }
  0x3c   : > { %537 = vmatprep.subr.bf16.mxu0 %v2396_v1  ;;  %617 = vmatprep.subr.bf16.mxu1 %v2396_v1 }
  0x3d   : > { %1954 = vmatprep.mubr.msk.bf16.mxu0 %vm369_vm0, %v1940_v19  ;;  %1965 = vmatprep.mubr.msk.bf16.mxu1 %vm369_vm0, %v1963_v20 }
  0x3f   : > { %538 = vmatpush1.bf16.msra.mxu0 %v2473_v2  ;;  %618 = vmatpush1.bf16.msra.mxu1 %v2473_v2 }
  0x40   : > { %539 = vmatprep.subr.bf16.mxu0 %v2396_v1  ;;  %619 = vmatprep.subr.bf16.mxu1 %v2396_v1 }
  0x42   : > { %417 = vmatmul.mubr.bf16.gmra.mrb[4].mxu0 %v1939_v21  ;;  %496 = vmatmul.mubr.bf16.gmra.mrb[4].mxu1 %v1962_v22 }
  0x43   : > { %540 = vmatpush1.bf16.msra.mxu0 %v2485_v3  ;;  %620 = vmatpush1.bf16.msra.mxu1 %v2485_v3 }
  0x44   : > { %541 = vmatprep.subr.bf16.mxu0 %v2396_v1  ;;  %621 = vmatprep.subr.bf16.mxu1 %v2396_v1 }
  0x45   : > { %1975 = vmatprep.mubr.msk.bf16.mxu0 %vm369_vm0, %v2317_v23  ;;  %1986 = vmatprep.mubr.msk.bf16.mxu1 %vm369_vm0, %v2320_v24 }
  0x47   : > { %542 = vmatpush1.bf16.msra.mxu0 %v2498_v4  ;;  %622 = vmatpush1.bf16.msra.mxu1 %v2498_v4 }
  0x48   : > { %543 = vmatprep.subr.bf16.mxu0 %v2396_v1  ;;  %623 = vmatprep.subr.bf16.mxu1 %v2396_v1 }
  0x4b   : > { %544 = vmatpush1.bf16.msra.mxu0 %v2510_v6  ;;  %624 = vmatpush1.bf16.msra.mxu1 %v2510_v6 }
  0x4c   : > { %545 = vmatprep.subr.bf16.mxu0 %v2396_v1  ;;  %625 = vmatprep.subr.bf16.mxu1 %v2396_v1 }
  0x4f   : > { %546 = vmatpush1.bf16.msra.mxu0 %v2522_v8  ;;  %626 = vmatpush1.bf16.msra.mxu1 %v2522_v8 }
  0x50   : > { %547 = vmatprep.subr.bf16.mxu0 %v2396_v1  ;;  %627 = vmatprep.subr.bf16.mxu1 %v2396_v1 }
  0x53   : > { %548 = vmatpush1.bf16.msra.mxu0 %v2529_v9  ;;  %628 = vmatpush1.bf16.msra.mxu1 %v2529_v9 }
  0x54   : > { %549 = vmatprep.subr.bf16.mxu0 %v2396_v1  ;;  %629 = vmatprep.subr.bf16.mxu1 %v2396_v1 }
  0x57   : > { %550 = vmatpush1.bf16.msra.mxu0 %v2540_v10  ;;  %630 = vmatpush1.bf16.msra.mxu1 %v2540_v10 }
  0x58   : > { %551 = vmatprep.subr.bf16.mxu0 %v2396_v1  ;;  %631 = vmatprep.subr.bf16.mxu1 %v2396_v1 }
  0x5b   : > { %552 = vmatpush1.bf16.msra.mxu0 %v2549_v11  ;;  %632 = vmatpush1.bf16.msra.mxu1 %v2549_v11 }
  0x5c   : > { %553 = vmatprep.subr.bf16.mxu0 %v2396_v1  ;;  %633 = vmatprep.subr.bf16.mxu1 %v2396_v1 }
  0x5f   : > { %554 = vmatpush1.bf16.msra.mxu0 %v2558_v12  ;;  %634 = vmatpush1.bf16.msra.mxu1 %v2558_v12 }
  0x60   : > { %555 = vmatprep.subr.bf16.mxu0 %v2396_v1  ;;  %635 = vmatprep.subr.bf16.mxu1 %v2396_v1 }
  0x63   : > { %556 = vmatpush1.bf16.msra.mxu0 %v2567_v13  ;;  %636 = vmatpush1.bf16.msra.mxu1 %v2567_v13 }
  0x64   : > { %557 = vmatprep.subr.bf16.mxu0 %v2396_v1  ;;  %637 = vmatprep.subr.bf16.mxu1 %v2396_v1 }
  0x67   : > { %558 = vmatpush1.bf16.msra.mxu0 %v2576_v14  ;;  %638 = vmatpush1.bf16.msra.mxu1 %v2576_v14 }
  0x68   : > { %695 = vmatprep.subr.bf16.mxu0 %v2396_v1  ;;  %775 = vmatprep.subr.bf16.mxu1 %v2396_v1 }
  0x6a   : > { %568 = vmatmul.mubr.bf16.vlgmr.msra.gmra.mrb[8].mxu0 %v2315_v25  ;;  %648 = vmatmul.mubr.bf16.vlgmr.msra.gmra.mrb[8].mxu1 %v2318_v26 }
  0x6b   : > { %696 = vmatpush1.bf16.msra.mxu0 %v2464_v0  ;;  %776 = vmatpush1.bf16.msra.mxu1 %v2464_v0 }
  0x6c   : > { %697 = vmatprep.subr.bf16.mxu0 %v2396_v1  ;;  %777 = vmatprep.subr.bf16.mxu1 %v2396_v1 }
  0x6d   : > { %1976 = vmatprep.mubr.msk.bf16.mxu0 %vm369_vm0, %v1974_v29  ;;  %1987 = vmatprep.mubr.msk.bf16.mxu1 %vm369_vm0, %v1985_v30 }
  0x6f   : > { %698 = vmatpush1.bf16.msra.mxu0 %v2473_v2  ;;  %778 = vmatpush1.bf16.msra.mxu1 %v2473_v2 }
  0x70   : > { %699 = vmatprep.subr.bf16.mxu0 %v2396_v1  ;;  %779 = vmatprep.subr.bf16.mxu1 %v2396_v1 }
  0x72   : > { %576 = vmatmul.mubr.bf16.gmra.mrb[12].mxu0 %v1973_v31  ;;  %656 = vmatmul.mubr.bf16.gmra.mrb[12].mxu1 %v1984_v32 }
  0x73   : > { %700 = vmatpush1.bf16.msra.mxu0 %v2485_v3  ;;  %780 = vmatpush1.bf16.msra.mxu1 %v2485_v3 }
  0x74   : > { %701 = vmatprep.subr.bf16.mxu0 %v2396_v1  ;;  %781 = vmatprep.subr.bf16.mxu1 %v2396_v1 }
  0x75   : > { %1997 = vmatprep.mubr.msk.bf16.mxu0 %vm369_vm0, %v2327_v33  ;;  %2008 = vmatprep.mubr.msk.bf16.mxu1 %vm369_vm0, %v2330_v34 }
  0x77   : > { %702 = vmatpush1.bf16.msra.mxu0 %v2498_v4  ;;  %782 = vmatpush1.bf16.msra.mxu1 %v2498_v4 }
  0x78   : > { %703 = vmatprep.subr.bf16.mxu0 %v2396_v1  ;;  %783 = vmatprep.subr.bf16.mxu1 %v2396_v1 }
  0x7b   : > { %704 = vmatpush1.bf16.msra.mxu0 %v2510_v6  ;;  %784 = vmatpush1.bf16.msra.mxu1 %v2510_v6 }
  0x7c   : > { %705 = vmatprep.subr.bf16.mxu0 %v2396_v1  ;;  %785 = vmatprep.subr.bf16.mxu1 %v2396_v1 }
  0x7f   : > { %706 = vmatpush1.bf16.msra.mxu0 %v2522_v8  ;;  %786 = vmatpush1.bf16.msra.mxu1 %v2522_v8 }
  0x80   : > { %707 = vmatprep.subr.bf16.mxu0 %v2396_v1  ;;  %787 = vmatprep.subr.bf16.mxu1 %v2396_v1 }
  0x83   : > { %708 = vmatpush1.bf16.msra.mxu0 %v2529_v9  ;;  %788 = vmatpush1.bf16.msra.mxu1 %v2529_v9 }
  0x84   : > { %709 = vmatprep.subr.bf16.mxu0 %v2396_v1  ;;  %789 = vmatprep.subr.bf16.mxu1 %v2396_v1 }
  0x87   : > { %710 = vmatpush1.bf16.msra.mxu0 %v2540_v10  ;;  %790 = vmatpush1.bf16.msra.mxu1 %v2540_v10 }
  0x88   : > { %711 = vmatprep.subr.bf16.mxu0 %v2396_v1  ;;  %791 = vmatprep.subr.bf16.mxu1 %v2396_v1 }
  0x8b   : > { %712 = vmatpush1.bf16.msra.mxu0 %v2549_v11  ;;  %792 = vmatpush1.bf16.msra.mxu1 %v2549_v11 }
  0x8c   : > { %713 = vmatprep.subr.bf16.mxu0 %v2396_v1  ;;  %793 = vmatprep.subr.bf16.mxu1 %v2396_v1 }
  0x8f   : > { %714 = vmatpush1.bf16.msra.mxu0 %v2558_v12  ;;  %794 = vmatpush1.bf16.msra.mxu1 %v2558_v12 }
  0x90   : > { %715 = vmatprep.subr.bf16.mxu0 %v2396_v1  ;;  %795 = vmatprep.subr.bf16.mxu1 %v2396_v1 }
  0x93   : > { %716 = vmatpush1.bf16.msra.mxu0 %v2567_v13  ;;  %796 = vmatpush1.bf16.msra.mxu1 %v2567_v13 }
  0x94   : > { %717 = vmatprep.subr.bf16.mxu0 %v2396_v1  ;;  %797 = vmatprep.subr.bf16.mxu1 %v2396_v1 }
  0x97   : > { %718 = vmatpush1.bf16.msra.mxu0 %v2576_v14  ;;  %798 = vmatpush1.bf16.msra.mxu1 %v2576_v14 }
  0x98   : > { %855 = vmatprep.subr.bf16.mxu0 %v2396_v1  ;;  %935 = vmatprep.subr.bf16.mxu1 %v2396_v1 }
  0x9a   : > { %728 = vmatmul.mubr.bf16.vlgmr.msra.gmra.mrb[16].mxu0 %v2325_v35  ;;  %808 = vmatmul.mubr.bf16.vlgmr.msra.gmra.mrb[16].mxu1 %v2328_v36 }
  0x9b   : > { %856 = vmatpush1.bf16.msra.mxu0 %v2464_v0  ;;  %936 = vmatpush1.bf16.msra.mxu1 %v2464_v0 }
  0x9c   : > { %857 = vmatprep.subr.bf16.mxu0 %v2396_v1  ;;  %937 = vmatprep.subr.bf16.mxu1 %v2396_v1 }
  0x9d   : > { %1998 = vmatprep.mubr.msk.bf16.mxu0 %vm369_vm0, %v1996_v39  ;;  %2009 = vmatprep.mubr.msk.bf16.mxu1 %vm369_vm0, %v2007_v40 }
  0x9f   : > { %858 = vmatpush1.bf16.msra.mxu0 %v2473_v2  ;;  %938 = vmatpush1.bf16.msra.mxu1 %v2473_v2 }
  0xa0   : > { %859 = vmatprep.subr.bf16.mxu0 %v2396_v1  ;;  %939 = vmatprep.subr.bf16.mxu1 %v2396_v1 }
  0xa2   : > { %736 = vmatmul.mubr.bf16.gmra.mrb[20].mxu0 %v1995_v41  ;;  %816 = vmatmul.mubr.bf16.gmra.mrb[20].mxu1 %v2006_v42 }
  0xa3   : > { %860 = vmatpush1.bf16.msra.mxu0 %v2485_v3  ;;  %940 = vmatpush1.bf16.msra.mxu1 %v2485_v3 }
  0xa4   : > { %861 = vmatprep.subr.bf16.mxu0 %v2396_v1  ;;  %941 = vmatprep.subr.bf16.mxu1 %v2396_v1 }
  0xa5   : > { %2019 = vmatprep.mubr.msk.bf16.mxu0 %vm369_vm0, %v2337_v43  ;;  %2030 = vmatprep.mubr.msk.bf16.mxu1 %vm369_vm0, %v2340_v44 }
  0xa7   : > { %862 = vmatpush1.bf16.msra.mxu0 %v2498_v4  ;;  %942 = vmatpush1.bf16.msra.mxu1 %v2498_v4 }
  0xa8   : > { %863 = vmatprep.subr.bf16.mxu0 %v2396_v1  ;;  %943 = vmatprep.subr.bf16.mxu1 %v2396_v1 }
  0xab   : > { %864 = vmatpush1.bf16.msra.mxu0 %v2510_v6  ;;  %944 = vmatpush1.bf16.msra.mxu1 %v2510_v6 }
  0xac   : > { %865 = vmatprep.subr.bf16.mxu0 %v2396_v1  ;;  %945 = vmatprep.subr.bf16.mxu1 %v2396_v1 }
  0xaf   : > { %866 = vmatpush1.bf16.msra.mxu0 %v2522_v8  ;;  %946 = vmatpush1.bf16.msra.mxu1 %v2522_v8 }
  0xb0   : > { %867 = vmatprep.subr.bf16.mxu0 %v2396_v1  ;;  %947 = vmatprep.subr.bf16.mxu1 %v2396_v1 }
  0xb3   : > { %868 = vmatpush1.bf16.msra.mxu0 %v2529_v9  ;;  %948 = vmatpush1.bf16.msra.mxu1 %v2529_v9 }
  0xb4   : > { %869 = vmatprep.subr.bf16.mxu0 %v2396_v1  ;;  %949 = vmatprep.subr.bf16.mxu1 %v2396_v1 }
  0xb7   : > { %870 = vmatpush1.bf16.msra.mxu0 %v2540_v10  ;;  %950 = vmatpush1.bf16.msra.mxu1 %v2540_v10 }
  0xb8   : > { %871 = vmatprep.subr.bf16.mxu0 %v2396_v1  ;;  %951 = vmatprep.subr.bf16.mxu1 %v2396_v1 }
  0xbb   : > { %872 = vmatpush1.bf16.msra.mxu0 %v2549_v11  ;;  %952 = vmatpush1.bf16.msra.mxu1 %v2549_v11 }
  0xbc   : > { %873 = vmatprep.subr.bf16.mxu0 %v2396_v1  ;;  %953 = vmatprep.subr.bf16.mxu1 %v2396_v1 }
  0xbf   : > { %874 = vmatpush1.bf16.msra.mxu0 %v2558_v12  ;;  %954 = vmatpush1.bf16.msra.mxu1 %v2558_v12 }
  0xc0   : > { %875 = vmatprep.subr.bf16.mxu0 %v2396_v1  ;;  %955 = vmatprep.subr.bf16.mxu1 %v2396_v1 }
  0xc3   : > { %876 = vmatpush1.bf16.msra.mxu0 %v2567_v13  ;;  %956 = vmatpush1.bf16.msra.mxu1 %v2567_v13 }
  0xc4   : > { %877 = vmatprep.subr.bf16.mxu0 %v2396_v1  ;;  %957 = vmatprep.subr.bf16.mxu1 %v2396_v1 }
  0xc7   : > { %878 = vmatpush1.bf16.msra.mxu0 %v2576_v14  ;;  %958 = vmatpush1.bf16.msra.mxu1 %v2576_v14 }
  0xc8   : > { %1015 = vmatprep.subr.bf16.mxu0 %v2396_v1  ;;  %1095 = vmatprep.subr.bf16.mxu1 %v2396_v1 }
  0xca   : > { %888 = vmatmul.mubr.bf16.vlgmr.msra.gmra.mrb[24].mxu0 %v2335_v45  ;;  %968 = vmatmul.mubr.bf16.vlgmr.msra.gmra.mrb[24].mxu1 %v2338_v46 }
  0xcb   : > { %1016 = vmatpush1.bf16.msra.mxu0 %v2464_v0  ;;  %1096 = vmatpush1.bf16.msra.mxu1 %v2464_v0 }
  0xcc   : > { %1017 = vmatprep.subr.bf16.mxu0 %v2396_v1  ;;  %1097 = vmatprep.subr.bf16.mxu1 %v2396_v1 }
  0xcd   : > { %2020 = vmatprep.mubr.msk.bf16.mxu0 %vm369_vm0, %v2018_v49  ;;  %2031 = vmatprep.mubr.msk.bf16.mxu1 %vm369_vm0, %v2029_v50 }
  0xcf   : > { %1018 = vmatpush1.bf16.msra.mxu0 %v2473_v2  ;;  %1098 = vmatpush1.bf16.msra.mxu1 %v2473_v2 }
  0xd0   : > { %1019 = vmatprep.subr.bf16.mxu0 %v2396_v1  ;;  %1099 = vmatprep.subr.bf16.mxu1 %v2396_v1 }
  0xd2   : > { %896 = vmatmul.mubr.bf16.gmra.mrb[28].mxu0 %v2017_v51  ;;  %976 = vmatmul.mubr.bf16.gmra.mrb[28].mxu1 %v2028_v52 }
  0xd3   : > { %1020 = vmatpush1.bf16.msra.mxu0 %v2485_v3  ;;  %1100 = vmatpush1.bf16.msra.mxu1 %v2485_v3 }
  0xd4   : > { %1021 = vmatprep.subr.bf16.mxu0 %v2396_v1  ;;  %1101 = vmatprep.subr.bf16.mxu1 %v2396_v1 }
  0xd5   : > { %2041 = vmatprep.mubr.msk.bf16.mxu0 %vm369_vm0, %v2347_v53  ;;  %2052 = vmatprep.mubr.msk.bf16.mxu1 %vm369_vm0, %v2350_v54 }
  0xd7   : > { %1022 = vmatpush1.bf16.msra.mxu0 %v2498_v4  ;;  %1102 = vmatpush1.bf16.msra.mxu1 %v2498_v4 }
  0xd8   : > { %1023 = vmatprep.subr.bf16.mxu0 %v2396_v1  ;;  %1103 = vmatprep.subr.bf16.mxu1 %v2396_v1 }
  0xdb   : > { %1024 = vmatpush1.bf16.msra.mxu0 %v2510_v6  ;;  %1104 = vmatpush1.bf16.msra.mxu1 %v2510_v6 }
  0xdc   : > { %1025 = vmatprep.subr.bf16.mxu0 %v2396_v1  ;;  %1105 = vmatprep.subr.bf16.mxu1 %v2396_v1 }
  0xdf   : > { %1026 = vmatpush1.bf16.msra.mxu0 %v2522_v8  ;;  %1106 = vmatpush1.bf16.msra.mxu1 %v2522_v8 }
  0xe0   : > { %1027 = vmatprep.subr.bf16.mxu0 %v2396_v1  ;;  %1107 = vmatprep.subr.bf16.mxu1 %v2396_v1 }
  0xe3   : > { %1028 = vmatpush1.bf16.msra.mxu0 %v2529_v9  ;;  %1108 = vmatpush1.bf16.msra.mxu1 %v2529_v9 }
  0xe4   : > { %1029 = vmatprep.subr.bf16.mxu0 %v2396_v1  ;;  %1109 = vmatprep.subr.bf16.mxu1 %v2396_v1 }
  0xe7   : > { %1030 = vmatpush1.bf16.msra.mxu0 %v2540_v10  ;;  %1110 = vmatpush1.bf16.msra.mxu1 %v2540_v10 }
  0xe8   : > { %1031 = vmatprep.subr.bf16.mxu0 %v2396_v1  ;;  %1111 = vmatprep.subr.bf16.mxu1 %v2396_v1 }
  0xeb   : > { %1032 = vmatpush1.bf16.msra.mxu0 %v2549_v11  ;;  %1112 = vmatpush1.bf16.msra.mxu1 %v2549_v11 }
  0xec   : > { %1033 = vmatprep.subr.bf16.mxu0 %v2396_v1  ;;  %1113 = vmatprep.subr.bf16.mxu1 %v2396_v1 }
  0xef   : > { %1034 = vmatpush1.bf16.msra.mxu0 %v2558_v12  ;;  %1114 = vmatpush1.bf16.msra.mxu1 %v2558_v12 }
  0xf0   : > { %1035 = vmatprep.subr.bf16.mxu0 %v2396_v1  ;;  %1115 = vmatprep.subr.bf16.mxu1 %v2396_v1 }
  0xf3   : > { %1036 = vmatpush1.bf16.msra.mxu0 %v2567_v13  ;;  %1116 = vmatpush1.bf16.msra.mxu1 %v2567_v13 }
  0xf4   : > { %1037 = vmatprep.subr.bf16.mxu0 %v2396_v1  ;;  %1117 = vmatprep.subr.bf16.mxu1 %v2396_v1 }
  0xf7   : > { %1038 = vmatpush1.bf16.msra.mxu0 %v2576_v14  ;;  %1118 = vmatpush1.bf16.msra.mxu1 %v2576_v14 }
  0xf8   : > { %2185 = vmatprep.subr.bf16.mxu0 %v2397_v61  ;;  %2193 = vmatprep.subr.bf16.mxu1 %v2397_v61 }
  0xfa   : > { %1048 = vmatmul.mubr.bf16.vlgmr.msra.gmra.mrb[32].mxu0 %v2345_v57  ;;  %1128 = vmatmul.mubr.bf16.vlgmr.msra.gmra.mrb[32].mxu1 %v2348_v58  ;;  %v2832_v57 = vld [vmem:[%s2955_s2] sm:$0xff]  }
  0xfb   : > { %2042 = vmatprep.mubr.msk.bf16.mxu0 %vm369_vm0, %v2040_v59  ;;  %2053 = vmatprep.mubr.msk.bf16.mxu1 %vm369_vm0, %v2051_v60 }
 0x102   : > { %1056 = vmatmul.mubr.bf16.gmra.mrb[36].mxu0 %v2039_v62  ;;  %1136 = vmatmul.mubr.bf16.gmra.mrb[36].mxu1 %v2050_v63 }
 0x103   : > { %2189 = vmatprep.mubr.msk.bf16.mxu0 %vm2398_vm1, %v2397_v61  ;;  %2197 = vmatprep.mubr.msk.bf16.mxu1 %vm2398_vm1, %v2397_v61 }
 0x10d   : > { %v410_v0 = vpop.f32.mrb[0].mxu0  ;;  %v489_v1 = vpop.f32.mrb[0].mxu1 }
 0x10e   : > { %v412_v2 = vpop.f32.mrb[1].mxu0  ;;  %v491_v3 = vpop.f32.mrb[1].mxu1  ;;  %v1157_v4 = vadd.f32 %v489_v1, %v410_v0 }
 0x10f   : > { %v413_v5 = vpop.f32.mrb[2].mxu0  ;;  %v492_v6 = vpop.f32.mrb[2].mxu1 }
 0x110   : > { %v415_v7 = vpop.f32.mrb[3].mxu0  ;;  %v494_v8 = vpop.f32.mrb[3].mxu1  ;;  %v1158_v9 = vadd.f32 %v492_v6, %v413_v5 }
 0x115   : > { %v418_v10 = vpop.f32.mrb[4].mxu0  ;;  %v497_v11 = vpop.f32.mrb[4].mxu1 }
 0x116   : > { %426 = vst [vmem:[#allocation2 + $0x10] sm:$0x3] %v418_v10  ;;  %v420_v12 = vpop.f32.mrb[5].mxu0  ;;  %506 = vst [vmem:[#allocation2 + $0x28] sm:$0x3] %v497_v11  ;;  %v499_v13 = vpop.f32.mrb[5].mxu1 }
 0x117   : > { %v421_v14 = vpop.f32.mrb[6].mxu0  ;;  %v500_v15 = vpop.f32.mrb[6].mxu1 }
 0x118   : > { %v422_v16 = vpop.f32.mrb[7].mxu0  ;;  %v501_v17 = vpop.f32.mrb[7].mxu1 }
 0x11d   : > { %v1153_v44 = vld [vmem:[#allocation2 + $0x10] sm:$0x3]  ;;  %v1156_v45 = vld [vmem:[#allocation2 + $0x28] sm:$0x3] }
 0x11e   : > { %v1159_v46 = vadd.f32 %v1156_v45, %v1153_v44  ;;  %v1252_v47 = vld [vmem:[#allocation2 + $0x28] sm:$0x3] }
 0x13d   : > { %v569_v18 = vpop.f32.mrb[8].mxu0  ;;  %v649_v19 = vpop.f32.mrb[8].mxu1 }
 0x13e   : > { %v571_v20 = vpop.f32.mrb[9].mxu0  ;;  %v651_v21 = vpop.f32.mrb[9].mxu1  ;;  %v1163_v22 = vadd.f32 %v1157_v4, %v569_v18  ;;  %v1256_v23 = vadd.f32 %v569_v18, %v489_v1  ;;  %v1334_v24 = vadd.f32 %v649_v19, %v569_v18 }
 0x13f   : > { %v572_v25 = vpop.f32.mrb[10].mxu0  ;;  %v652_v26 = vpop.f32.mrb[10].mxu1 }
 0x140   : > { %v574_v27 = vpop.f32.mrb[11].mxu0  ;;  %v654_v28 = vpop.f32.mrb[11].mxu1  ;;  %v1164_v29 = vadd.f32 %v1158_v9, %v572_v25  ;;  %v1257_v30 = vadd.f32 %v572_v25, %v492_v6  ;;  %v1262_v31 = vadd.f32 %v1256_v23, %v649_v19  ;;  %v1335_v32 = vadd.f32 %v652_v26, %v572_v25 }
 0x142   : > { %v1166_v33 = vpack.c.bf16 %v1164_v29, %v1163_v22  ;;  %v1263_v34 = vadd.f32 %v1257_v30, %v652_v26 }
 0x144   : > { %2186 = vmatpush3.bf16.msra.mxu0 %v1166_v33  ;;  %v1265_v35 = vpack.c.bf16 %v1263_v34, %v1262_v31 }
 0x145   : > { %v577_v36 = vpop.f32.mrb[12].mxu0  ;;  %v657_v37 = vpop.f32.mrb[12].mxu1  ;;  %2187 = vmatprep.subr.bf16.mxu0 %v2397_v61 }
 0x146   : > { %586 = vst [vmem:[#allocation2 + $0x40] sm:$0x3] %v577_v36  ;;  %666 = vst [vmem:[#allocation2 + $0x58] sm:$0x3] %v657_v37  ;;  %2194 = vmatpush3.bf16.msra.mxu1 %v1265_v35  ;;  %v579_v38 = vpop.f32.mrb[13].mxu0  ;;  %v659_v39 = vpop.f32.mrb[13].mxu1 }
 0x147   : > { %2195 = vmatprep.subr.bf16.mxu1 %v2397_v61  ;;  %v580_v40 = vpop.f32.mrb[14].mxu0  ;;  %v660_v41 = vpop.f32.mrb[14].mxu1 }
 0x148   : > { %v581_v42 = vpop.f32.mrb[15].mxu0  ;;  %v661_v43 = vpop.f32.mrb[15].mxu1 }
 0x14d   : > { %v1162_v48 = vld [vmem:[#allocation2 + $0x40] sm:$0x3]  ;;  %v1261_v50 = vld [vmem:[#allocation2 + $0x58] sm:$0x3] }
 0x14e   : > { %v1255_v49 = vld [vmem:[#allocation2 + $0x40] sm:$0x3]  ;;  %v1165_v51 = vadd.f32 %v1162_v48, %v1159_v46  ;;  %v1333_v23 = vld [vmem:[#allocation2 + $0x58] sm:$0x3] }
 0x14f   : > { %v1258_v52 = vadd.f32 %v1255_v49, %v1252_v47  ;;  %v1330_v22 = vld [vmem:[#allocation2 + $0x40] sm:$0x3]  ;;  %v1408_v25 = vld [vmem:[#allocation2 + $0x58] sm:$0x3] }
 0x150   : > { %v1167_v53 = vpack.c.bf16 %v1165_v51, %v1165_v51 }
 0x151   : > { %v1264_v54 = vadd.f32 %v1261_v50, %v1258_v52 }
 0x152   : > { %v1179_v55 = vsel %vm1177_vm2, %v1167_v53, 0 }
 0x153   : > { %v1266_v56 = vpack.c.bf16 %v1264_v54, %v1264_v54  ;;  %2188 = vmatpush3.bf16.msra.mxu0 %v1179_v55 }
 0x154   : > { %2201 = vmatprep.subr.bf16.mxu0 %v2397_v61 }
 0x155   : > { %v1268_v58 = vsel %vm1177_vm2, %v1266_v56, 0 }
 0x156   : > { %2196 = vmatpush3.bf16.msra.mxu1 %v1268_v58  ;;  %2190 = vmatmul.mubr.msk.bf16.vlgmr.msra.gmra.mrb[40].mxu0 %vm1173_vm3, %v2832_v57 }
 0x157   : > { %2209 = vmatprep.subr.bf16.mxu1 %v2397_v61  ;;  %2205 = vmatprep.mubr.msk.bf16.mxu0 %vm2398_vm1, %v2397_v61 }
 0x159   : > { %2198 = vmatmul.mubr.msk.bf16.vlgmr.msra.gmra.mrb[40].mxu1 %vm1173_vm3, %v2832_v57 }
 0x15a   : > { %2213 = vmatprep.mubr.msk.bf16.mxu1 %vm2398_vm1, %v2397_v61 }
 0x16d   : > { %v729_v59 = vpop.f32.mrb[16].mxu0  ;;  %v809_v60 = vpop.f32.mrb[16].mxu1 }
 0x16e   : > { %v731_v62 = vpop.f32.mrb[17].mxu0  ;;  %v811_v63 = vpop.f32.mrb[17].mxu1  ;;  %v1340_v0 = vadd.f32 %v1334_v24, %v729_v59  ;;  %v1412_v1 = vadd.f32 %v729_v59, %v649_v19  ;;  %v1490_v2 = vadd.f32 %v809_v60, %v729_v59  ;;  %v1336_v24 = vadd.f32 %v1333_v23, %v1330_v22 }
 0x16f   : > { %v732_v3 = vpop.f32.mrb[18].mxu0  ;;  %v812_v4 = vpop.f32.mrb[18].mxu1 }
 0x170   : > { %v734_v5 = vpop.f32.mrb[19].mxu0  ;;  %v814_v6 = vpop.f32.mrb[19].mxu1  ;;  %v1341_v7 = vadd.f32 %v1335_v32, %v732_v3  ;;  %v1413_v8 = vadd.f32 %v732_v3, %v652_v26  ;;  %v1418_v9 = vadd.f32 %v1412_v1, %v809_v60  ;;  %v1491_v10 = vadd.f32 %v812_v4, %v732_v3 }
 0x172   : > { %v1343_v11 = vpack.c.bf16 %v1341_v7, %v1340_v0  ;;  %v1419_v12 = vadd.f32 %v1413_v8, %v812_v4 }
 0x174   : > { %2202 = vmatpush3.bf16.msra.mxu0 %v1343_v11  ;;  %v1421_v13 = vpack.c.bf16 %v1419_v12, %v1418_v9 }
 0x175   : > { %v737_v14 = vpop.f32.mrb[20].mxu0  ;;  %v817_v15 = vpop.f32.mrb[20].mxu1  ;;  %2203 = vmatprep.subr.bf16.mxu0 %v2397_v61 }
 0x176   : > { %746 = vst [vmem:[#allocation2 + $0x70] sm:$0x3] %v737_v14  ;;  %826 = vst [vmem:[#allocation2 + $0x88] sm:$0x3] %v817_v15  ;;  %2210 = vmatpush3.bf16.msra.mxu1 %v1421_v13  ;;  %v739_v16 = vpop.f32.mrb[21].mxu0  ;;  %v819_v17 = vpop.f32.mrb[21].mxu1 }
 0x177   : > { %2211 = vmatprep.subr.bf16.mxu1 %v2397_v61  ;;  %v740_v18 = vpop.f32.mrb[22].mxu0  ;;  %v820_v19 = vpop.f32.mrb[22].mxu1 }
 0x178   : > { %v741_v20 = vpop.f32.mrb[23].mxu0  ;;  %v821_v21 = vpop.f32.mrb[23].mxu1 }
 0x17d   : > { %v1339_v26 = vld [vmem:[#allocation2 + $0x70] sm:$0x3]  ;;  %v1417_v28 = vld [vmem:[#allocation2 + $0x88] sm:$0x3] }
 0x17e   : > { %v1411_v27 = vld [vmem:[#allocation2 + $0x70] sm:$0x3]  ;;  %v1342_v29 = vadd.f32 %v1339_v26, %v1336_v24  ;;  %v1489_v1 = vld [vmem:[#allocation2 + $0x88] sm:$0x3] }
 0x17f   : > { %v1414_v30 = vadd.f32 %v1411_v27, %v1408_v25  ;;  %v1486_v0 = vld [vmem:[#allocation2 + $0x70] sm:$0x3]  ;;  %v1564_v3 = vld [vmem:[#allocation2 + $0x88] sm:$0x3] }
 0x180   : > { %v1344_v31 = vpack.c.bf16 %v1342_v29, %v1342_v29 }
 0x181   : > { %v1420_v32 = vadd.f32 %v1417_v28, %v1414_v30 }
 0x182   : > { %v1346_v33 = vsel %vm1177_vm2, %v1344_v31, 0 }
 0x183   : > { %v1422_v34 = vpack.c.bf16 %v1420_v32, %v1420_v32  ;;  %2204 = vmatpush3.bf16.msra.mxu0 %v1346_v33 }
 0x184   : > { %2217 = vmatprep.subr.bf16.mxu0 %v2397_v61 }
 0x185   : > { %v1424_v35 = vsel %vm1177_vm2, %v1422_v34, 0 }
 0x186   : > { %2212 = vmatpush3.bf16.msra.mxu1 %v1424_v35  ;;  %2206 = vmatmul.mubr.msk.bf16.vlgmr.msra.gmra.mrb[44].mxu0 %vm1173_vm3, %v2832_v57 }
 0x187   : > { %2225 = vmatprep.subr.bf16.mxu1 %v2397_v61  ;;  %2221 = vmatprep.mubr.msk.bf16.mxu0 %vm2398_vm1, %v2397_v61 }
 0x189   : > { %2214 = vmatmul.mubr.msk.bf16.vlgmr.msra.gmra.mrb[44].mxu1 %vm1173_vm3, %v2832_v57 }
 0x18a   : > { %2229 = vmatprep.mubr.msk.bf16.mxu1 %vm2398_vm1, %v2397_v61 }
 0x19d   : > { %v889_v36 = vpop.f32.mrb[24].mxu0  ;;  %v969_v37 = vpop.f32.mrb[24].mxu1 }
 0x19e   : > { %v891_v38 = vpop.f32.mrb[25].mxu0  ;;  %v971_v39 = vpop.f32.mrb[25].mxu1  ;;  %v1496_v40 = vadd.f32 %v1490_v2, %v889_v36  ;;  %v1568_v41 = vadd.f32 %v889_v36, %v809_v60  ;;  %v1646_v42 = vadd.f32 %v969_v37, %v889_v36  ;;  %v1492_v2 = vadd.f32 %v1489_v1, %v1486_v0 }
 0x19f   : > { %v892_v43 = vpop.f32.mrb[26].mxu0  ;;  %v972_v44 = vpop.f32.mrb[26].mxu1 }
 0x1a0   : > { %v894_v45 = vpop.f32.mrb[27].mxu0  ;;  %v974_v46 = vpop.f32.mrb[27].mxu1  ;;  %v1497_v47 = vadd.f32 %v1491_v10, %v892_v43  ;;  %v1569_v48 = vadd.f32 %v892_v43, %v812_v4  ;;  %v1574_v49 = vadd.f32 %v1568_v41, %v969_v37  ;;  %v1647_v50 = vadd.f32 %v972_v44, %v892_v43 }
 0x1a2   : > { %v1499_v51 = vpack.c.bf16 %v1497_v47, %v1496_v40  ;;  %v1575_v52 = vadd.f32 %v1569_v48, %v972_v44 }
 0x1a4   : > { %2218 = vmatpush3.bf16.msra.mxu0 %v1499_v51  ;;  %v1577_v53 = vpack.c.bf16 %v1575_v52, %v1574_v49  ;;  %v2885_v51 = vld [vmem:[%s2956_s3] ss:$0 sm:$0xff] }
 0x1a5   : > { %v897_v54 = vpop.f32.mrb[28].mxu0  ;;  %v977_v55 = vpop.f32.mrb[28].mxu1  ;;  %2219 = vmatprep.subr.bf16.mxu0 %v2397_v61  ;;  %v2891_v52 = vld [vmem:[%s2957_s4] ss:$0 sm:$0xff] }
 0x1a6   : > { %906 = vst [vmem:[#allocation2 + $0xa0] sm:$0x3] %v897_v54  ;;  %986 = vst [vmem:[#allocation2 + $0xb8] sm:$0x3] %v977_v55  ;;  %2226 = vmatpush3.bf16.msra.mxu1 %v1577_v53  ;;  %v899_v56 = vpop.f32.mrb[29].mxu0  ;;  %v979_v58 = vpop.f32.mrb[29].mxu1 }
 0x1a7   : > { %2227 = vmatprep.subr.bf16.mxu1 %v2397_v61  ;;  %v900_v59 = vpop.f32.mrb[30].mxu0  ;;  %v980_v60 = vpop.f32.mrb[30].mxu1 }
 0x1a8   : > { %v901_v62 = vpop.f32.mrb[31].mxu0  ;;  %v981_v63 = vpop.f32.mrb[31].mxu1 }
 0x1ad   : > { %v1495_v4 = vld [vmem:[#allocation2 + $0xa0] sm:$0x3]  ;;  %v1573_v6 = vld [vmem:[#allocation2 + $0xb8] sm:$0x3] }
 0x1ae   : > { %v1567_v5 = vld [vmem:[#allocation2 + $0xa0] sm:$0x3]  ;;  %v1498_v7 = vadd.f32 %v1495_v4, %v1492_v2  ;;  %v1645_v39 = vld [vmem:[#allocation2 + $0xb8] sm:$0x3] }
 0x1af   : > { %v1570_v8 = vadd.f32 %v1567_v5, %v1564_v3  ;;  %v1642_v38 = vld [vmem:[#allocation2 + $0xa0] sm:$0x3]  ;;  %v1720_v41 = vld [vmem:[#allocation2 + $0xb8] sm:$0x3] }
 0x1b0   : > { %v1500_v9 = vpack.c.bf16 %v1498_v7, %v1498_v7  ;;  %v1648_v40 = vadd.f32 %v1645_v39, %v1642_v38 }
 0x1b1   : > { %v1576_v10 = vadd.f32 %v1573_v6, %v1570_v8 }
 0x1b2   : > { %v1502_v11 = vsel %vm1177_vm2, %v1500_v9, 0 }
 0x1b3   : > { %v1578_v12 = vpack.c.bf16 %v1576_v10, %v1576_v10  ;;  %2220 = vmatpush3.bf16.msra.mxu0 %v1502_v11 }
 0x1b4   : > { %2233 = vmatprep.subr.bf16.mxu0 %v2397_v61 }
 0x1b5   : > { %v1580_v13 = vsel %vm1177_vm2, %v1578_v12, 0 }
 0x1b6   : > { %2228 = vmatpush3.bf16.msra.mxu1 %v1580_v13  ;;  %2222 = vmatmul.mubr.msk.bf16.vlgmr.msra.gmra.mrb[48].mxu0 %vm1173_vm3, %v2832_v57 }
 0x1b7   : > { %2241 = vmatprep.subr.bf16.mxu1 %v2397_v61  ;;  %2237 = vmatprep.mubr.msk.bf16.mxu0 %vm2398_vm1, %v2397_v61 }
 0x1b9   : > { %2230 = vmatmul.mubr.msk.bf16.vlgmr.msra.gmra.mrb[48].mxu1 %vm1173_vm3, %v2832_v57 }
 0x1ba   : > { %2245 = vmatprep.mubr.msk.bf16.mxu1 %vm2398_vm1, %v2397_v61 }
 0x1cd   : > { %v1049_v14 = vpop.f32.mrb[32].mxu0  ;;  %v1129_v15 = vpop.f32.mrb[32].mxu1 }
 0x1ce   : > { %v1051_v16 = vpop.f32.mrb[33].mxu0  ;;  %v1131_v17 = vpop.f32.mrb[33].mxu1  ;;  %v1652_v18 = vadd.f32 %v1646_v42, %v1049_v14  ;;  %v1724_v19 = vadd.f32 %v1049_v14, %v969_v37 }
 0x1cf   : > { %v1052_v20 = vpop.f32.mrb[34].mxu0  ;;  %v1132_v21 = vpop.f32.mrb[34].mxu1 }
 0x1d0   : > { %v1054_v22 = vpop.f32.mrb[35].mxu0  ;;  %v1134_v23 = vpop.f32.mrb[35].mxu1  ;;  %v1653_v24 = vadd.f32 %v1647_v50, %v1052_v20  ;;  %v1725_v25 = vadd.f32 %v1052_v20, %v972_v44  ;;  %v1730_v26 = vadd.f32 %v1724_v19, %v1129_v15 }
 0x1d2   : > { %v1655_v27 = vpack.c.bf16 %v1653_v24, %v1652_v18  ;;  %v1731_v28 = vadd.f32 %v1725_v25, %v1132_v21 }
 0x1d4   : > { %2234 = vmatpush3.bf16.msra.mxu0 %v1655_v27  ;;  %v1733_v29 = vpack.c.bf16 %v1731_v28, %v1730_v26 }
 0x1d5   : > { %v1057_v30 = vpop.f32.mrb[36].mxu0  ;;  %v1137_v31 = vpop.f32.mrb[36].mxu1  ;;  %2235 = vmatprep.subr.bf16.mxu0 %v2397_v61 }
 0x1d6   : > { %1066 = vst [vmem:[#allocation2 + $0xd0] sm:$0x3] %v1057_v30  ;;  %1146 = vst [vmem:[#allocation2 + $0xe8] sm:$0x3] %v1137_v31  ;;  %v1059_v32 = vpop.f32.mrb[37].mxu0  ;;  %v1139_v33 = vpop.f32.mrb[37].mxu1  ;;  %2242 = vmatpush3.bf16.msra.mxu1 %v1733_v29 }
 0x1d7   : > { %v1060_v34 = vpop.f32.mrb[38].mxu0  ;;  %v1140_v35 = vpop.f32.mrb[38].mxu1  ;;  %2243 = vmatprep.subr.bf16.mxu1 %v2397_v61 }
 0x1d8   : > { %v1061_v36 = vpop.f32.mrb[39].mxu0  ;;  %v1141_v37 = vpop.f32.mrb[39].mxu1 }
 0x1dd   : > { %v1651_v42 = vld [vmem:[#allocation2 + $0xd0] sm:$0x3]  ;;  %v1729_v44 = vld [vmem:[#allocation2 + $0xe8] sm:$0x3] }
 0x1de   : > { %v1723_v43 = vld [vmem:[#allocation2 + $0xd0] sm:$0x3]  ;;  %v1654_v45 = vadd.f32 %v1651_v42, %v1648_v40 }
 0x1df   : > { %v1726_v46 = vadd.f32 %v1723_v43, %v1720_v41 }
 0x1e0   : > { %v1656_v47 = vpack.c.bf16 %v1654_v45, %v1654_v45 }
 0x1e1   : > { %v1732_v48 = vadd.f32 %v1729_v44, %v1726_v46 }
 0x1e2   : > { %v1658_v49 = vsel %vm1177_vm2, %v1656_v47, 0 }
 0x1e3   : > { %v1734_v50 = vpack.c.bf16 %v1732_v48, %v1732_v48  ;;  %2236 = vmatpush3.bf16.msra.mxu0 %v1658_v49 }
 0x1e5   : > { %v1736_v61 = vsel %vm1177_vm2, %v1734_v50, 0 }
 0x1e6   : > { %2244 = vmatpush3.bf16.msra.mxu1 %v1736_v61  ;;  %2238 = vmatmul.mubr.msk.bf16.vlgmr.msra.gmra.mrb[52].mxu0 %vm1173_vm3, %v2832_v57 }
 0x1e9   : > { %2246 = vmatmul.mubr.msk.bf16.vlgmr.msra.gmra.mrb[52].mxu1 %vm1173_vm3, %v2832_v57 }
 0x229   : > { %v1215_v53 = vpop.f32.mrb[40].mxu0 }
 0x22a   : > { %v1228_v54 = vmul.f32 %v2885_v51, %v1215_v53  ;;  %v2191_v55 = vpop.f32.mrb[41].mxu0 }
 0x22b   : > { %v1218_v56 = vpop.f32.mrb[42].mxu0 }
 0x22c   : > { %v1304_v57 = vpop.f32.mrb[40].mxu1  ;;  %v1236_v58 = vadd.f32 %v2891_v52, %v1228_v54  ;;  %v1229_v62 = vmul.f32 %v2885_v51, %v1218_v56  ;;  %v2192_v63 = vpop.f32.mrb[43].mxu0 }
 0x22d   : > { %v1311_v59 = vmul.f32 %v2885_v51, %v1304_v57  ;;  %v2199_v60 = vpop.f32.mrb[41].mxu1 }
 0x22e   : > { %v1307_v0 = vpop.f32.mrb[42].mxu1  ;;  %v1238_v1 = vmax.f32 %v1236_v58, 0.0  ;;  %v1237_v3 = vadd.f32 %v2891_v52, %v1229_v62 }
 0x22f   : > { %v1313_v2 = vadd.f32 %v2891_v52, %v1311_v59  ;;  %v1312_v4 = vmul.f32 %v2885_v51, %v1307_v0  ;;  %v2200_v5 = vpop.f32.mrb[43].mxu1 }
 0x230   : > { %v1239_v7 = vmax.f32 %v1237_v3, 0.0 }
 0x231   : > { %v1315_v6 = vmax.f32 %v1313_v2, 0.0  ;;  %v1314_v8 = vadd.f32 %v2891_v52, %v1312_v4 }
 0x232   : > { %v2117_v9 = vpack.c.bf16 %v1239_v7, %v1238_v1 }
 0x233   : > { %v1316_v10 = vmax.f32 %v1314_v8, 0.0 }
 0x234   : > { %2118 = vst [vmem:[%s2904_s30] sm:$0xff] %v2117_v9  }
 0x235   : > { %v2122_v11 = vpack.c.bf16 %v1316_v10, %v1315_v6 }
 0x237   : > { %2154 = vst [vmem:[%s2904_s30 + $0x8] sm:$0xff] %v2122_v11  }
 0x259   : > { %v1382_v12 = vpop.f32.mrb[44].mxu0 }
 0x25a   : > { %v1389_v13 = vmul.f32 %v2885_v51, %v1382_v12  ;;  %v2207_v14 = vpop.f32.mrb[45].mxu0 }
 0x25b   : > { %v1385_v16 = vpop.f32.mrb[46].mxu0 }
 0x25c   : > { %v1460_v15 = vpop.f32.mrb[44].mxu1  ;;  %v1391_v17 = vadd.f32 %v2891_v52, %v1389_v13  ;;  %v1390_v20 = vmul.f32 %v2885_v51, %v1385_v16  ;;  %v2208_v21 = vpop.f32.mrb[47].mxu0 }
 0x25d   : > { %v1467_v18 = vmul.f32 %v2885_v51, %v1460_v15  ;;  %v2215_v19 = vpop.f32.mrb[45].mxu1 }
 0x25e   : > { %v1463_v22 = vpop.f32.mrb[46].mxu1  ;;  %v1393_v23 = vmax.f32 %v1391_v17, 0.0  ;;  %v1392_v25 = vadd.f32 %v2891_v52, %v1390_v20 }
 0x25f   : > { %v1469_v24 = vadd.f32 %v2891_v52, %v1467_v18  ;;  %v1468_v26 = vmul.f32 %v2885_v51, %v1463_v22  ;;  %v2216_v27 = vpop.f32.mrb[47].mxu1 }
 0x260   : > { %v1394_v29 = vmax.f32 %v1392_v25, 0.0 }
 0x261   : > { %v1471_v28 = vmax.f32 %v1469_v24, 0.0  ;;  %v1470_v30 = vadd.f32 %v2891_v52, %v1468_v26 }
 0x262   : > { %v2127_v31 = vpack.c.bf16 %v1394_v29, %v1393_v23 }
 0x263   : > { %v1472_v32 = vmax.f32 %v1470_v30, 0.0 }
 0x264   : > { %2155 = vst [vmem:[%s2904_s30 + $0x10] sm:$0xff] %v2127_v31  }
 0x265   : > { %v2132_v33 = vpack.c.bf16 %v1472_v32, %v1471_v28 }
 0x267   : > { %2156 = vst [vmem:[%s2904_s30 + $0x18] sm:$0xff] %v2132_v33  }
 0x289   : > { %v1538_v34 = vpop.f32.mrb[48].mxu0 }
 0x28a   : > { %v1545_v35 = vmul.f32 %v2885_v51, %v1538_v34  ;;  %v2223_v36 = vpop.f32.mrb[49].mxu0 }
 0x28b   : > { %v1541_v38 = vpop.f32.mrb[50].mxu0 }
 0x28c   : > { %v1616_v37 = vpop.f32.mrb[48].mxu1  ;;  %v1547_v39 = vadd.f32 %v2891_v52, %v1545_v35  ;;  %v1546_v42 = vmul.f32 %v2885_v51, %v1541_v38  ;;  %v2224_v43 = vpop.f32.mrb[51].mxu0 }
 0x28d   : > { %v1623_v40 = vmul.f32 %v2885_v51, %v1616_v37  ;;  %v2231_v41 = vpop.f32.mrb[49].mxu1 }
 0x28e   : > { %v1619_v44 = vpop.f32.mrb[50].mxu1  ;;  %v1549_v45 = vmax.f32 %v1547_v39, 0.0  ;;  %v1548_v47 = vadd.f32 %v2891_v52, %v1546_v42 }
 0x28f   : > { %v1625_v46 = vadd.f32 %v2891_v52, %v1623_v40  ;;  %v1624_v48 = vmul.f32 %v2885_v51, %v1619_v44  ;;  %v2232_v49 = vpop.f32.mrb[51].mxu1 }
 0x290   : > { %v1550_v61 = vmax.f32 %v1548_v47, 0.0 }
 0x291   : > { %v1627_v50 = vmax.f32 %v1625_v46, 0.0  ;;  %v1626_v53 = vadd.f32 %v2891_v52, %v1624_v48 }
 0x292   : > { %v2137_v54 = vpack.c.bf16 %v1550_v61, %v1549_v45 }
 0x293   : > { %v1628_v55 = vmax.f32 %v1626_v53, 0.0 }
 0x294   : > { %2157 = vst [vmem:[%s2904_s30 + $0x20] sm:$0xff] %v2137_v54  }
 0x295   : > { %v2142_v57 = vpack.c.bf16 %v1628_v55, %v1627_v50 }
 0x297   : > { %2158 = vst [vmem:[%s2904_s30 + $0x28] sm:$0xff] %v2142_v57  }
 0x2b9   : > { %v1694_v56 = vpop.f32.mrb[52].mxu0 }
 0x2ba   : > { %v1701_v58 = vmul.f32 %v2885_v51, %v1694_v56  ;;  %v2239_v59 = vpop.f32.mrb[53].mxu0 }
 0x2bb   : > { %v1697_v60 = vpop.f32.mrb[54].mxu0 }
 0x2bc   : > { %v1772_v62 = vpop.f32.mrb[52].mxu1  ;;  %v1703_v63 = vadd.f32 %v2891_v52, %v1701_v58  ;;  %v1702_v0 = vmul.f32 %v2885_v51, %v1697_v60  ;;  %v2240_v2 = vpop.f32.mrb[55].mxu0 }
 0x2bd   : > { %v1779_v1 = vmul.f32 %v2885_v51, %v1772_v62  ;;  %v2247_v3 = vpop.f32.mrb[53].mxu1 }
 0x2be   : > { %v1775_v4 = vpop.f32.mrb[54].mxu1  ;;  %v1705_v5 = vmax.f32 %v1703_v63, 0.0  ;;  %v1704_v6 = vadd.f32 %v2891_v52, %v1702_v0 }
 0x2bf   : > { %v1781_v7 = vadd.f32 %v2891_v52, %v1779_v1  ;;  %v1780_v8 = vmul.f32 %v2885_v51, %v1775_v4  ;;  %v2248_v9 = vpop.f32.mrb[55].mxu1 }
 0x2c0   : > { %v1706_v10 = vmax.f32 %v1704_v6, 0.0 }
 0x2c1   : > { %v1782_v11 = vadd.f32 %v2891_v52, %v1780_v8  ;;  %v1783_v13 = vmax.f32 %v1781_v7, 0.0 }
 0x2c2   : > { %v2147_v12 = vpack.c.bf16 %v1706_v10, %v1705_v5 }
 0x2c3   : > { %v1784_v14 = vmax.f32 %v1782_v11, 0.0 }
 0x2c4   : > { %2159 = vst [vmem:[%s2904_s30 + $0x30] sm:$0xff] %v2147_v12  }
 0x2c5   : > { %v2152_v15 = vpack.c.bf16 %v1784_v14, %v1783_v13 }
 0x2c7   : > { %2160 = vst [vmem:[%s2904_s30 + $0x38] sm:$0xff] %v2152_v15  }
 0x2c8 PF: > { %s15_s22 = sadd.s32 1, %s2394_s22   ;;  %s2959_s18 = smov %s2386_s20 }
 0x2c9   : > { %p12_p7 = scmp.ge.s32.totalorder %s15_s22, 6   ;;  %s2960_s19 = smov %s2390_s21 }
 0x2ca   : > { %s2961_s20 = smov %s2964_s23  ;;  %s2962_s21 = smov %s2968_s24 }
 0x2cb   :  { %14 = sbr.rel (!%p12_p7) target bundleno = 3 (0x3), region = 96 }

</bundles_post_ra>
